<compile_context>
chip_gen: v7x
topology: tpu7x:2x2x1
jax: 0.10.0
libtpu: 0.0.40
codegen_flags: <defaults>
</compile_context>

<pallas_src>
import functools

import jax
import jax.numpy as jnp
from jax.experimental import pallas as pl
from jax.experimental.pallas import tpu as pltpu


# ---------------------------------------------------------------------------
# In-kernel helper: 3x3 conv (stride 1, pad 1) + folded BN (+ optional ReLU)
# + ring/tail re-zeroing, on a zero-ring padded, lane-padded activation laid
# out as (C, n).  One MXU dot: (Cout, 9*Cin) x (9*Cin, n).
# ---------------------------------------------------------------------------
def _conv3x3_bn(x, w_ref, scale, bias, *, relu, mask, wp, n):
    """x: (Cin, n) activation in the padded frame (ring & tail == 0).
    w_ref: (Cout, 9*Cin) bf16 weights; column index = (kh*3+kw)*Cin + ci
           (PyTorch cross-correlation taps).
    scale/bias: (Cout, 1) f32 folded BatchNorm.
    mask: (1, n) f32, 1 on interior pixels, 0 on ring + lane-pad tail.
    Returns (Cout, n) f32 with ring/tail zeroed (valid zero padding for the
    next conv)."""
    cin = x.shape[0]
    s_ext = wp + 1                                         # keeps every shifted slice in-bounds
    xb = x.astype(jnp.bfloat16)
    zpad = jnp.zeros((cin, s_ext), dtype=jnp.bfloat16)
    xext = jnp.concatenate([zpad, xb, zpad], axis=1)       # (Cin, n + 2*(wp+1))
    taps = []
    for kh in range(3):
        for kw in range(3):
            off = s_ext + (kh - 1) * wp + (kw - 1)         # static python int
            taps.append(xext[:, off:off + n])              # shifted (Cin, n)
    xs = jnp.concatenate(taps, axis=0)                     # (9*Cin, n) bf16
    out = jnp.dot(w_ref[...], xs, preferred_element_type=jnp.float32)
    out = out * scale + bias
    if relu:
        out = jnp.maximum(out, 0.0)
    return out * mask


# ---------------------------------------------------------------------------
# Fused kernel: conv1+bn1+relu -> conv2+bn2 -> Adapt_SE -> conv3+bn3+relu.
# One grid step == one batch element.
# ---------------------------------------------------------------------------
def _domain_se_block_kernel(
    x_ref, mask_ref,
    w1_ref, w2_ref, w3_ref, bn_ref,
    wc_ref, bc_ref,
    w1a_ref, b1a_ref, w2a_ref, b2a_ref,
    wf1_ref, bf1_ref, wf2_ref, bf2_ref,
    o_ref,
    *, wp, n, hw, nb, c2):
    mask = mask_ref[...]                                   # (1, n): 1 interior / 0 ring+tail
    x0 = x_ref[0]                                          # (Cin, n) bf16, ring & tail == 0

    bn = bn_ref[...]                                       # (C, 6) packed folded-BN params
    s1, b1 = bn[:, 0:1], bn[:, 1:2]
    s2, b2 = bn[:, 2:3], bn[:, 3:4]
    s3, b3 = bn[:, 4:5], bn[:, 5:6]

    # conv1 -> bn1 -> relu   (ring/tail re-zeroed: acts as conv2's zero padding)
    a1 = _conv3x3_bn(x0, w1_ref, s1, b1, relu=True, mask=mask, wp=wp, n=n)
    # conv2 -> bn2
    a2 = _conv3x3_bn(a1, w2_ref, s2, b2, relu=False, mask=mask, wp=wp, n=n)

    # --------------------- Adapt_SE_block (f32, column form) ----------------
    inv_hw = 1.0 / float(hw)
    # Global avg / max pooling of the feature map (interior only; ring/tail are 0).
    avg = jnp.sum(a2, axis=1, keepdims=True) * inv_hw                          # (C, 1)
    mx = jnp.max(jnp.where(mask > 0.5, a2, -1e30), axis=1, keepdims=True)      # (C, 1)

    # 1x1 "domain" conv and its global avg / max pooling.
    dom = jnp.dot(wc_ref[...], a2, preferred_element_type=jnp.float32) + bc_ref[...]   # (nb, n)
    d_avg = jnp.sum(dom * mask, axis=1, keepdims=True) * inv_hw                        # (nb, 1)
    d_max = jnp.max(jnp.where(mask > 0.5, dom, -1e30), axis=1, keepdims=True)          # (nb, 1)

    # Adaptor MLPs: avg & max pooled vectors are the 2 columns of vt;
    # layer 1 of all nb adaptors is one stacked dot.
    vt = jnp.concatenate([avg, mx], axis=1)                # (C, 2)
    h_all = jnp.maximum(
        jnp.dot(w1a_ref[...], vt, preferred_element_type=jnp.float32) + b1a_ref[...],
        0.0)                                               # (nb*c2, 2)

    # Domain attention: fc1 -> relu -> fc2 -> softmax over nb, avg & max batched.
    dt = jnp.concatenate([d_avg, d_max], axis=1)           # (nb, 2)
    h_att = jnp.maximum(
        jnp.dot(wf1_ref[...], dt, preferred_element_type=jnp.float32) + bf1_ref[...],
        0.0)                                               # (nb2, 2)
    z = jnp.dot(wf2_ref[...], h_att, preferred_element_type=jnp.float32) + bf2_ref[...]  # (nb, 2)
    z = z - jnp.max(z, axis=0, keepdims=True)
    e = jnp.exp(z)
    att = e / jnp.sum(e, axis=0, keepdims=True)            # softmax over nb (per column)
    att_w = att[:, 0:1] + att[:, 1:2]                      # (nb, 1): att_avg + att_max

    # domain_recal_att[c] = sum_i (adaptor_i(avg) + adaptor_i(max))[c] * att_w[i]
    gate_acc = jnp.zeros_like(avg)                         # (C, 1)
    for i in range(nb):
        h_i = h_all[i * c2:(i + 1) * c2, :]                # (c2, 2)
        r_i = jax.nn.sigmoid(
            jnp.dot(w2a_ref[i], h_i, preferred_element_type=jnp.float32) + b2a_ref[i])  # (C, 2)
        recal_i = r_i[:, 0:1] + r_i[:, 1:2]                # (C, 1)
        gate_acc = gate_acc + recal_i * att_w[i:i + 1, :]
    gate = jax.nn.sigmoid(gate_acc)                        # (C, 1)
    y = a2 * gate + a2                                     # x*att + residual; ring/tail stay 0

    # conv3 -> bn3 -> relu  (interior sliced out in the wrapper)
    out = _conv3x3_bn(y, w3_ref, s3, b3, relu=True, mask=mask, wp=wp, n=n)
    o_ref[0] = out                                         # (C, n) lane-dense store


# ---------------------------------------------------------------------------
# Parameter preparation (PyTorch layouts -> kernel layouts) and the wrapper.
# ---------------------------------------------------------------------------
def _fold_bn(bn, eps=1e-5):
    scale = bn["gamma"] / jnp.sqrt(bn["var"] + eps)
    bias = bn["beta"] - bn["mean"] * scale
    return scale.astype(jnp.float32), bias.astype(jnp.float32)


def _conv_w_flat(w):
    """(Cout, Cin, 3, 3) PyTorch conv weight -> (Cout, 9*Cin) bf16,
    column index = (kh*3+kw)*Cin + ci (matches the in-kernel tap stack)."""
    cout, cin = w.shape[0], w.shape[1]
    return jnp.transpose(w, (0, 2, 3, 1)).reshape(cout, 9 * cin).astype(jnp.bfloat16)


def _prepare_kernel_params(p):
    s1, b1 = _fold_bn(p["bn1"])
    s2, b2 = _fold_bn(p["bn2"])
    s3, b3 = _fold_bn(p["bn3"])
    bn_pack = jnp.stack([s1, b1, s2, b2, s3, b3], axis=1)          # (C, 6)
    se = p["se"]
    nb, c2, C = se["w1"].shape            # adaptor layer-1 weights: (nb, C2, C) = (out, in)
    return {
        "w1": _conv_w_flat(p["conv1_w"]),
        "w2": _conv_w_flat(p["conv2_w"]),
        "w3": _conv_w_flat(p["conv3_w"]),
        "bn": bn_pack,
        "wc": se["conv_w"].reshape(se["conv_w"].shape[0], -1).astype(jnp.float32),  # (nb, C)
        "bc": se["conv_b"].reshape(-1, 1).astype(jnp.float32),                      # (nb, 1)
        "w1a": se["w1"].reshape(nb * c2, C).astype(jnp.float32),                    # stacked (C2,C)
        "b1a": se["b1"].reshape(nb * c2, 1).astype(jnp.float32),
        "w2a": se["w2"].astype(jnp.float32),                                        # (nb, C, C2)
        "b2a": se["b2"].reshape(nb, C, 1).astype(jnp.float32),
        "wf1": se["fc1_w"].astype(jnp.float32), "bf1": se["fc1_b"].reshape(-1, 1).astype(jnp.float32),
        "wf2": se["fc2_w"].astype(jnp.float32), "bf2": se["fc2_b"].reshape(-1, 1).astype(jnp.float32),
    }


def domain_se_conv_block(x_nchw, params):
    """Forward pass. x_nchw: (B, Cin, H, W) f32 (PyTorch layout). Returns NCHW f32."""
    kp = _prepare_kernel_params(params)
    B, cin, H, W = x_nchw.shape
    C = kp["bn"].shape[0]
    nb = kp["wc"].shape[0]
    nb2 = kp["wf1"].shape[0]
    c2 = kp["w2a"].shape[2]
    hp, wp = H + 2, W + 2
    n_raw = hp * wp
    n = ((n_raw + 127) // 128) * 128      # lane-dense padded spatial length

    # Cheap wrapper glue: spatial zero-pad + flatten + lane-pad + bf16 cast (no im2col).
    xflat = jnp.pad(x_nchw, ((0, 0), (0, 0), (1, 1), (1, 1))).reshape(B, cin, n_raw)
    xflat = jnp.pad(xflat, ((0, 0), (0, 0), (0, n - n_raw))).astype(jnp.bfloat16)
    mask = jnp.pad(jnp.ones((H, W), jnp.float32), ((1, 1), (1, 1))).reshape(1, n_raw)
    mask = jnp.pad(mask, ((0, 0), (0, n - n_raw)))

    kernel = functools.partial(_domain_se_block_kernel,
                               wp=wp, n=n, hw=H * W, nb=nb, c2=c2)
    z2 = lambda b: (0, 0)
    z3 = lambda b: (0, 0, 0)
    out_flat = pl.pallas_call(
        kernel,
        out_shape=jax.ShapeDtypeStruct((B, C, n), jnp.float32),
        grid=(B,),
        in_specs=[
            pl.BlockSpec((1, cin, n), lambda b: (b, 0, 0)),
            pl.BlockSpec((1, n), z2),
            pl.BlockSpec((C, 9 * cin), z2),
            pl.BlockSpec((C, 9 * C), z2),
            pl.BlockSpec((C, 9 * C), z2),
            pl.BlockSpec((C, 6), z2),
            pl.BlockSpec((nb, C), z2),
            pl.BlockSpec((nb, 1), z2),
            pl.BlockSpec((nb * c2, C), z2),
            pl.BlockSpec((nb * c2, 1), z2),
            pl.BlockSpec((nb, C, c2), z3),
            pl.BlockSpec((nb, C, 1), z3),
            pl.BlockSpec((nb2, nb), z2),
            pl.BlockSpec((nb2, 1), z2),
            pl.BlockSpec((nb, nb2), z2),
            pl.BlockSpec((nb, 1), z2),
        ],
        out_specs=pl.BlockSpec((1, C, n), lambda b: (b, 0, 0)),
        compiler_params=pltpu.CompilerParams(dimension_semantics=("parallel",)),
    )(xflat, mask,
      kp["w1"], kp["w2"], kp["w3"], kp["bn"],
      kp["wc"], kp["bc"],
      kp["w1a"], kp["b1a"], kp["w2a"], kp["b2a"],
      kp["wf1"], kp["bf1"], kp["wf2"], kp["bf2"])
    # Drop the lane-pad tail and the padding ring, back to NCHW.
    return out_flat[:, :, :n_raw].reshape(B, C, hp, wp)[:, :, 1:1 + H, 1:1 + W]


# ---------------------------------------------------------------------------
# Pure-JAX reference (same bf16 conv-operand / f32 epilogue policy) and params.
# ---------------------------------------------------------------------------
def _reference_forward(x, params):
    def conv_bn(x, w, bn, relu):
        y = jax.lax.conv_general_dilated(
            x.astype(jnp.bfloat16), w.astype(jnp.bfloat16),
            window_strides=(1, 1), padding=((1, 1), (1, 1)),
            dimension_numbers=("NCHW", "OIHW", "NCHW"),
            preferred_element_type=jnp.float32)
        scale = bn["gamma"] / jnp.sqrt(bn["var"] + 1e-5)
        bias = bn["beta"] - bn["mean"] * scale
        y = y * scale[None, :, None, None] + bias[None, :, None, None]
        return jnp.maximum(y, 0.0) if relu else y

    def se(x, p):
        nb = p["conv_w"].shape[0]
        dom = jax.lax.conv_general_dilated(
            x, p["conv_w"], (1, 1), ((0, 0), (0, 0)),
            dimension_numbers=("NCHW", "OIHW", "NCHW"),
            preferred_element_type=jnp.float32) + p["conv_b"][None, :, None, None]
        avg, mx = jnp.mean(x, axis=(2, 3)), jnp.max(x, axis=(2, 3))          # (B, C)
        d_avg, d_max = jnp.mean(dom, axis=(2, 3)), jnp.max(dom, axis=(2, 3))  # (B, nb)

        def adaptor(v, i):
            h = jnp.maximum(v @ p["w1"][i].T + p["b1"][i], 0.0)
            return jax.nn.sigmoid(h @ p["w2"][i].T + p["b2"][i])

        recal = jnp.stack([adaptor(avg, i) + adaptor(mx, i) for i in range(nb)], axis=1)

        def att(v):
            h = jnp.maximum(v @ p["fc1_w"].T + p["fc1_b"], 0.0)
            return jax.nn.softmax(h @ p["fc2_w"].T + p["fc2_b"], axis=1)

        w = att(d_avg) + att(d_max)                                           # (B, nb)
        gate = jax.nn.sigmoid(jnp.einsum("bnc,bn->bc", recal, w))[:, :, None, None]
        return x * gate + x

    out = conv_bn(x, params["conv1_w"], params["bn1"], True)
    out = conv_bn(out, params["conv2_w"], params["bn2"], False)
    out = se(out, params["se"])
    out = conv_bn(out, params["conv3_w"], params["bn3"], True)
    return out


def init_params(key, inplanes, planes, num_adaptor=4, shrink=2):
    """Deterministic synthetic parameters in PyTorch layouts."""
    nb = num_adaptor
    nb2 = round(nb / 2)
    c2 = planes // shrink
    keys = iter(jax.random.split(key, 32))
    s = 0.1

    def nrm(shape):
        return s * jax.random.normal(next(keys), shape, jnp.float32)

    def bn(c):
        return {"gamma": 1.0 + 0.1 * jax.random.normal(next(keys), (c,), jnp.float32),
                "beta": nrm((c,)),
                "mean": nrm((c,)),
                "var": 0.5 + jax.random.uniform(next(keys), (c,), jnp.float32)}

    return {
        "conv1_w": nrm((planes, inplanes, 3, 3)),
        "conv2_w": nrm((planes, planes, 3, 3)),
        "conv3_w": nrm((planes, planes, 3, 3)),
        "bn1": bn(planes), "bn2": bn(planes), "bn3": bn(planes),
        "se": {
            "conv_w": nrm((nb, planes, 1, 1)), "conv_b": nrm((nb,)),
            "w1": nrm((nb, c2, planes)), "b1": nrm((nb, c2)),
            "w2": nrm((nb, planes, c2)), "b2": nrm((nb, planes)),
            "fc1_w": nrm((nb2, nb)), "fc1_b": nrm((nb2,)),
            "fc2_w": nrm((nb, nb2)), "fc2_b": nrm((nb,)),
        },
    }


if __name__ == "__main__":
    key = jax.random.PRNGKey(0)
    kx, kp = jax.random.split(key)
    B, inplanes, planes, H, W = 2, 4, 16, 16, 16

    x = jax.random.normal(kx, (B, inplanes, H, W), jnp.float32)   # PyTorch NCHW layout
    params = init_params(kp, inplanes, planes, num_adaptor=4, shrink=2)

    out = jax.jit(domain_se_conv_block)(x, params)
    jax.block_until_ready(out)
    assert out.shape == (B, planes, H, W)

    ref = _reference_forward(x, params)
    err = float(jnp.max(jnp.abs(out - ref)))
    assert err < 5e-2, f"mismatch vs pure-JAX reference: max abs err = {err}"

    print("KERNEL_OK")
</pallas_src>

<mosaic_0001>
module attributes {stable_mosaic.version = 11 : i64} {
  func.func @_domain_se_block_kernel(%arg0: i32, %arg1: memref<1x4x384xbf16, #tpu.memory_space<vmem>>, %arg2: memref<1x384xf32, #tpu.memory_space<vmem>>, %arg3: memref<16x36xbf16, #tpu.memory_space<vmem>>, %arg4: memref<16x144xbf16, #tpu.memory_space<vmem>>, %arg5: memref<16x144xbf16, #tpu.memory_space<vmem>>, %arg6: memref<16x6xf32, #tpu.memory_space<vmem>>, %arg7: memref<4x16xf32, #tpu.memory_space<vmem>>, %arg8: memref<4x1xf32, #tpu.memory_space<vmem>>, %arg9: memref<32x16xf32, #tpu.memory_space<vmem>>, %arg10: memref<32x1xf32, #tpu.memory_space<vmem>>, %arg11: memref<4x16x8xf32, #tpu.memory_space<vmem>>, %arg12: memref<4x16x1xf32, #tpu.memory_space<vmem>>, %arg13: memref<2x4xf32, #tpu.memory_space<vmem>>, %arg14: memref<2x1xf32, #tpu.memory_space<vmem>>, %arg15: memref<4x2xf32, #tpu.memory_space<vmem>>, %arg16: memref<4x1xf32, #tpu.memory_space<vmem>>, %arg17: memref<1x16x384xf32, #tpu.memory_space<vmem>>) attributes {dimension_semantics = [#tpu.dimension_semantics<parallel>], iteration_bounds = array<i64: 2>, scalar_prefetch = 0 : i64, scratch_operands = 0 : i64, tpu.core_type = #tpu.core_type<tc>, window_params = [{transform_indices = @transform_0, window_bounds = array<i64: 1, 4, 384>}, {pipeline_mode = #tpu.pipeline_mode<synchronous>, transform_indices = @transform_1, window_bounds = array<i64: 1, 384>}, {pipeline_mode = #tpu.pipeline_mode<synchronous>, transform_indices = @transform_2, window_bounds = array<i64: 16, 36>}, {pipeline_mode = #tpu.pipeline_mode<synchronous>, transform_indices = @transform_3, window_bounds = array<i64: 16, 144>}, {pipeline_mode = #tpu.pipeline_mode<synchronous>, transform_indices = @transform_4, window_bounds = array<i64: 16, 144>}, {pipeline_mode = #tpu.pipeline_mode<synchronous>, transform_indices = @transform_5, window_bounds = array<i64: 16, 6>}, {pipeline_mode = #tpu.pipeline_mode<synchronous>, transform_indices = @transform_6, window_bounds = array<i64: 4, 16>}, {pipeline_mode = #tpu.pipeline_mode<synchronous>, transform_indices = @transform_7, window_bounds = array<i64: 4, 1>}, {pipeline_mode = #tpu.pipeline_mode<synchronous>, transform_indices = @transform_8, window_bounds = array<i64: 32, 16>}, {pipeline_mode = #tpu.pipeline_mode<synchronous>, transform_indices = @transform_9, window_bounds = array<i64: 32, 1>}, {pipeline_mode = #tpu.pipeline_mode<synchronous>, transform_indices = @transform_10, window_bounds = array<i64: 4, 16, 8>}, {pipeline_mode = #tpu.pipeline_mode<synchronous>, transform_indices = @transform_11, window_bounds = array<i64: 4, 16, 1>}, {pipeline_mode = #tpu.pipeline_mode<synchronous>, transform_indices = @transform_12, window_bounds = array<i64: 2, 4>}, {pipeline_mode = #tpu.pipeline_mode<synchronous>, transform_indices = @transform_13, window_bounds = array<i64: 2, 1>}, {pipeline_mode = #tpu.pipeline_mode<synchronous>, transform_indices = @transform_14, window_bounds = array<i64: 4, 2>}, {pipeline_mode = #tpu.pipeline_mode<synchronous>, transform_indices = @transform_15, window_bounds = array<i64: 4, 1>}, {transform_indices = @transform_16, window_bounds = array<i64: 1, 16, 384>}]} {
    %c0 = arith.constant 0 : index
    %c0_0 = arith.constant 0 : index
    %0 = vector.load %arg2[%c0, %c0_0] : memref<1x384xf32, #tpu.memory_space<vmem>>, vector<1x384xf32>
    %c0_1 = arith.constant 0 : index
    %c0_2 = arith.constant 0 : index
    %c0_3 = arith.constant 0 : index
    %1 = vector.load %arg1[%c0_1, %c0_2, %c0_3] : memref<1x4x384xbf16, #tpu.memory_space<vmem>>, vector<1x4x384xbf16>
    %2 = vector.shape_cast %1 : vector<1x4x384xbf16> to vector<4x384xbf16>
    %c0_4 = arith.constant 0 : index
    %c0_5 = arith.constant 0 : index
    %3 = vector.load %arg6[%c0_4, %c0_5] : memref<16x6xf32, #tpu.memory_space<vmem>>, vector<16x6xf32>
    %4 = vector.extract_strided_slice %3 {offsets = [0, 0], sizes = [16, 1], strides = [1, 1]} : vector<16x6xf32> to vector<16x1xf32>
    %5 = vector.extract_strided_slice %3 {offsets = [0, 1], sizes = [16, 1], strides = [1, 1]} : vector<16x6xf32> to vector<16x1xf32>
    %6 = vector.extract_strided_slice %3 {offsets = [0, 2], sizes = [16, 1], strides = [1, 1]} : vector<16x6xf32> to vector<16x1xf32>
    %7 = vector.extract_strided_slice %3 {offsets = [0, 3], sizes = [16, 1], strides = [1, 1]} : vector<16x6xf32> to vector<16x1xf32>
    %8 = vector.extract_strided_slice %3 {offsets = [0, 4], sizes = [16, 1], strides = [1, 1]} : vector<16x6xf32> to vector<16x1xf32>
    %9 = vector.extract_strided_slice %3 {offsets = [0, 5], sizes = [16, 1], strides = [1, 1]} : vector<16x6xf32> to vector<16x1xf32>
    %cst = arith.constant 0.000000e+00 : bf16
    %10 = vector.broadcast %cst : bf16 to vector<4x19xbf16>
    %11 = tpu.concatenate %10, %2, %10 in 1 : vector<4x19xbf16>, vector<4x384xbf16>, vector<4x19xbf16> -> vector<4x422xbf16>
    %12 = vector.extract_strided_slice %11 {offsets = [0, 0], sizes = [4, 384], strides = [1, 1]} : vector<4x422xbf16> to vector<4x384xbf16>
    %13 = vector.extract_strided_slice %11 {offsets = [0, 1], sizes = [4, 384], strides = [1, 1]} : vector<4x422xbf16> to vector<4x384xbf16>
    %14 = vector.extract_strided_slice %11 {offsets = [0, 2], sizes = [4, 384], strides = [1, 1]} : vector<4x422xbf16> to vector<4x384xbf16>
    %15 = vector.extract_strided_slice %11 {offsets = [0, 18], sizes = [4, 384], strides = [1, 1]} : vector<4x422xbf16> to vector<4x384xbf16>
    %16 = vector.extract_strided_slice %11 {offsets = [0, 19], sizes = [4, 384], strides = [1, 1]} : vector<4x422xbf16> to vector<4x384xbf16>
    %17 = vector.extract_strided_slice %11 {offsets = [0, 20], sizes = [4, 384], strides = [1, 1]} : vector<4x422xbf16> to vector<4x384xbf16>
    %18 = vector.extract_strided_slice %11 {offsets = [0, 36], sizes = [4, 384], strides = [1, 1]} : vector<4x422xbf16> to vector<4x384xbf16>
    %19 = vector.extract_strided_slice %11 {offsets = [0, 37], sizes = [4, 384], strides = [1, 1]} : vector<4x422xbf16> to vector<4x384xbf16>
    %20 = vector.extract_strided_slice %11 {offsets = [0, 38], sizes = [4, 384], strides = [1, 1]} : vector<4x422xbf16> to vector<4x384xbf16>
    %21 = tpu.concatenate %12, %13, %14, %15, %16, %17, %18, %19, %20 in 0 : vector<4x384xbf16>, vector<4x384xbf16>, vector<4x384xbf16>, vector<4x384xbf16>, vector<4x384xbf16>, vector<4x384xbf16>, vector<4x384xbf16>, vector<4x384xbf16>, vector<4x384xbf16> -> vector<36x384xbf16>
    %c0_6 = arith.constant 0 : index
    %c0_7 = arith.constant 0 : index
    %22 = vector.load %arg3[%c0_6, %c0_7] : memref<16x36xbf16, #tpu.memory_space<vmem>>, vector<16x36xbf16>
    %cst_8 = arith.constant dense<0.000000e+00> : vector<16x384xf32>
    %23 = tpu.matmul %22, %21, %cst_8 {dimension_numbers = #tpu.dot_dimension_numbers<[1], [0], [0], [1], [0, 0, 1, 1], [], []>} : vector<16x36xbf16>, vector<36x384xbf16>, vector<16x384xf32> -> vector<16x384xf32>
    %24 = vector.broadcast %4 : vector<16x1xf32> to vector<16x384xf32>
    %25 = arith.mulf %23, %24 : vector<16x384xf32>
    %26 = vector.broadcast %5 : vector<16x1xf32> to vector<16x384xf32>
    %27 = arith.addf %25, %26 : vector<16x384xf32>
    %cst_9 = arith.constant 0.000000e+00 : f32
    %28 = vector.broadcast %cst_9 : f32 to vector<16x384xf32>
    %29 = arith.maximumf %27, %28 : vector<16x384xf32>
    %30 = vector.broadcast %0 : vector<1x384xf32> to vector<16x384xf32>
    %31 = arith.mulf %29, %30 : vector<16x384xf32>
    %32 = arith.truncf %31 : vector<16x384xf32> to vector<16x384xbf16>
    %cst_10 = arith.constant 0.000000e+00 : bf16
    %33 = vector.broadcast %cst_10 : bf16 to vector<16x19xbf16>
    %34 = tpu.concatenate %33, %32, %33 in 1 : vector<16x19xbf16>, vector<16x384xbf16>, vector<16x19xbf16> -> vector<16x422xbf16>
    %35 = vector.extract_strided_slice %34 {offsets = [0, 0], sizes = [16, 384], strides = [1, 1]} : vector<16x422xbf16> to vector<16x384xbf16>
    %36 = vector.extract_strided_slice %34 {offsets = [0, 1], sizes = [16, 384], strides = [1, 1]} : vector<16x422xbf16> to vector<16x384xbf16>
    %37 = vector.extract_strided_slice %34 {offsets = [0, 2], sizes = [16, 384], strides = [1, 1]} : vector<16x422xbf16> to vector<16x384xbf16>
    %38 = vector.extract_strided_slice %34 {offsets = [0, 18], sizes = [16, 384], strides = [1, 1]} : vector<16x422xbf16> to vector<16x384xbf16>
    %39 = vector.extract_strided_slice %34 {offsets = [0, 19], sizes = [16, 384], strides = [1, 1]} : vector<16x422xbf16> to vector<16x384xbf16>
    %40 = vector.extract_strided_slice %34 {offsets = [0, 20], sizes = [16, 384], strides = [1, 1]} : vector<16x422xbf16> to vector<16x384xbf16>
    %41 = vector.extract_strided_slice %34 {offsets = [0, 36], sizes = [16, 384], strides = [1, 1]} : vector<16x422xbf16> to vector<16x384xbf16>
    %42 = vector.extract_strided_slice %34 {offsets = [0, 37], sizes = [16, 384], strides = [1, 1]} : vector<16x422xbf16> to vector<16x384xbf16>
    %43 = vector.extract_strided_slice %34 {offsets = [0, 38], sizes = [16, 384], strides = [1, 1]} : vector<16x422xbf16> to vector<16x384xbf16>
    %44 = tpu.concatenate %35, %36, %37, %38, %39, %40, %41, %42, %43 in 0 : vector<16x384xbf16>, vector<16x384xbf16>, vector<16x384xbf16>, vector<16x384xbf16>, vector<16x384xbf16>, vector<16x384xbf16>, vector<16x384xbf16>, vector<16x384xbf16>, vector<16x384xbf16> -> vector<144x384xbf16>
    %c0_11 = arith.constant 0 : index
    %c0_12 = arith.constant 0 : index
    %45 = vector.load %arg4[%c0_11, %c0_12] : memref<16x144xbf16, #tpu.memory_space<vmem>>, vector<16x144xbf16>
    %cst_13 = arith.constant dense<0.000000e+00> : vector<16x384xf32>
    %46 = tpu.matmul %45, %44, %cst_13 {dimension_numbers = #tpu.dot_dimension_numbers<[1], [0], [0], [1], [0, 0, 1, 1], [], []>} : vector<16x144xbf16>, vector<144x384xbf16>, vector<16x384xf32> -> vector<16x384xf32>
    %47 = vector.broadcast %6 : vector<16x1xf32> to vector<16x384xf32>
    %48 = arith.mulf %46, %47 : vector<16x384xf32>
    %49 = vector.broadcast %7 : vector<16x1xf32> to vector<16x384xf32>
    %50 = arith.addf %48, %49 : vector<16x384xf32>
    %51 = vector.broadcast %0 : vector<1x384xf32> to vector<16x384xf32>
    %52 = arith.mulf %50, %51 : vector<16x384xf32>
    %cst_14 = arith.constant dense<0.000000e+00> : vector<16xf32>
    %53 = vector.multi_reduction <add>, %52, %cst_14 [1] : vector<16x384xf32> to vector<16xf32>
    %54 = vector.shape_cast %53 : vector<16xf32> to vector<16x1xf32>
    %cst_15 = arith.constant 3.906250e-03 : f32
    %55 = vector.broadcast %cst_15 : f32 to vector<16x1xf32>
    %56 = arith.mulf %54, %55 : vector<16x1xf32>
    %cst_16 = arith.constant 5.000000e-01 : f32
    %57 = vector.broadcast %cst_16 : f32 to vector<1x384xf32>
    %58 = arith.cmpf ogt, %0, %57 : vector<1x384xf32>
    %cst_17 = arith.constant -1.000000e+30 : f32
    %59 = vector.shape_cast %58 : vector<1x384xi1> to vector<1x384xi1>
    %60 = vector.broadcast %59 : vector<1x384xi1> to vector<16x384xi1>
    %61 = vector.broadcast %cst_17 : f32 to vector<16x384xf32>
    %62 = arith.select %60, %52, %61 : vector<16x384xi1>, vector<16x384xf32>
    %cst_18 = arith.constant dense<0xFF800000> : vector<16xf32>
    %63 = vector.multi_reduction <maximumf>, %62, %cst_18 [1] : vector<16x384xf32> to vector<16xf32>
    %64 = vector.shape_cast %63 : vector<16xf32> to vector<16x1xf32>
    %c0_19 = arith.constant 0 : index
    %c0_20 = arith.constant 0 : index
    %65 = vector.load %arg7[%c0_19, %c0_20] : memref<4x16xf32, #tpu.memory_space<vmem>>, vector<4x16xf32>
    %cst_21 = arith.constant dense<0.000000e+00> : vector<4x384xf32>
    %66 = tpu.matmul %65, %52, %cst_21 {dimension_numbers = #tpu.dot_dimension_numbers<[1], [0], [0], [1], [0, 0, 1, 1], [], []>} : vector<4x16xf32>, vector<16x384xf32>, vector<4x384xf32> -> vector<4x384xf32>
    %c0_22 = arith.constant 0 : index
    %c0_23 = arith.constant 0 : index
    %67 = vector.load %arg8[%c0_22, %c0_23] : memref<4x1xf32, #tpu.memory_space<vmem>>, vector<4x1xf32>
    %68 = vector.broadcast %67 : vector<4x1xf32> to vector<4x384xf32>
    %69 = arith.addf %66, %68 : vector<4x384xf32>
    %70 = vector.broadcast %0 : vector<1x384xf32> to vector<4x384xf32>
    %71 = arith.mulf %69, %70 : vector<4x384xf32>
    %cst_24 = arith.constant dense<0.000000e+00> : vector<4xf32>
    %72 = vector.multi_reduction <add>, %71, %cst_24 [1] : vector<4x384xf32> to vector<4xf32>
    %73 = vector.shape_cast %72 : vector<4xf32> to vector<4x1xf32>
    %cst_25 = arith.constant 3.906250e-03 : f32
    %74 = vector.broadcast %cst_25 : f32 to vector<4x1xf32>
    %75 = arith.mulf %73, %74 : vector<4x1xf32>
    %cst_26 = arith.constant 5.000000e-01 : f32
    %76 = vector.broadcast %cst_26 : f32 to vector<1x384xf32>
    %77 = arith.cmpf ogt, %0, %76 : vector<1x384xf32>
    %cst_27 = arith.constant -1.000000e+30 : f32
    %78 = vector.shape_cast %77 : vector<1x384xi1> to vector<1x384xi1>
    %79 = vector.broadcast %78 : vector<1x384xi1> to vector<4x384xi1>
    %80 = vector.broadcast %cst_27 : f32 to vector<4x384xf32>
    %81 = arith.select %79, %69, %80 : vector<4x384xi1>, vector<4x384xf32>
    %cst_28 = arith.constant dense<0xFF800000> : vector<4xf32>
    %82 = vector.multi_reduction <maximumf>, %81, %cst_28 [1] : vector<4x384xf32> to vector<4xf32>
    %83 = vector.shape_cast %82 : vector<4xf32> to vector<4x1xf32>
    %84 = tpu.concatenate %56, %64 in 1 : vector<16x1xf32>, vector<16x1xf32> -> vector<16x2xf32>
    %c0_29 = arith.constant 0 : index
    %c0_30 = arith.constant 0 : index
    %85 = vector.load %arg9[%c0_29, %c0_30] : memref<32x16xf32, #tpu.memory_space<vmem>>, vector<32x16xf32>
    %cst_31 = arith.constant dense<0.000000e+00> : vector<32x2xf32>
    %86 = tpu.matmul %85, %84, %cst_31 {dimension_numbers = #tpu.dot_dimension_numbers<[1], [0], [0], [1], [0, 0, 1, 1], [], []>} : vector<32x16xf32>, vector<16x2xf32>, vector<32x2xf32> -> vector<32x2xf32>
    %c0_32 = arith.constant 0 : index
    %c0_33 = arith.constant 0 : index
    %87 = vector.load %arg10[%c0_32, %c0_33] : memref<32x1xf32, #tpu.memory_space<vmem>>, vector<32x1xf32>
    %88 = vector.broadcast %87 : vector<32x1xf32> to vector<32x2xf32>
    %89 = arith.addf %86, %88 : vector<32x2xf32>
    %cst_34 = arith.constant 0.000000e+00 : f32
    %90 = vector.broadcast %cst_34 : f32 to vector<32x2xf32>
    %91 = arith.maximumf %89, %90 : vector<32x2xf32>
    %92 = tpu.concatenate %75, %83 in 1 : vector<4x1xf32>, vector<4x1xf32> -> vector<4x2xf32>
    %c0_35 = arith.constant 0 : index
    %c0_36 = arith.constant 0 : index
    %93 = vector.load %arg13[%c0_35, %c0_36] : memref<2x4xf32, #tpu.memory_space<vmem>>, vector<2x4xf32>
    %cst_37 = arith.constant dense<0.000000e+00> : vector<2x2xf32>
    %94 = tpu.matmul %93, %92, %cst_37 {dimension_numbers = #tpu.dot_dimension_numbers<[1], [0], [0], [1], [0, 0, 1, 1], [], []>} : vector<2x4xf32>, vector<4x2xf32>, vector<2x2xf32> -> vector<2x2xf32>
    %c0_38 = arith.constant 0 : index
    %c0_39 = arith.constant 0 : index
    %95 = vector.load %arg14[%c0_38, %c0_39] : memref<2x1xf32, #tpu.memory_space<vmem>>, vector<2x1xf32>
    %96 = vector.broadcast %95 : vector<2x1xf32> to vector<2x2xf32>
    %97 = arith.addf %94, %96 : vector<2x2xf32>
    %cst_40 = arith.constant 0.000000e+00 : f32
    %98 = vector.broadcast %cst_40 : f32 to vector<2x2xf32>
    %99 = arith.maximumf %97, %98 : vector<2x2xf32>
    %c0_41 = arith.constant 0 : index
    %c0_42 = arith.constant 0 : index
    %100 = vector.load %arg15[%c0_41, %c0_42] : memref<4x2xf32, #tpu.memory_space<vmem>>, vector<4x2xf32>
    %cst_43 = arith.constant dense<0.000000e+00> : vector<4x2xf32>
    %101 = tpu.matmul %100, %99, %cst_43 {dimension_numbers = #tpu.dot_dimension_numbers<[1], [0], [0], [1], [0, 0, 1, 1], [], []>} : vector<4x2xf32>, vector<2x2xf32>, vector<4x2xf32> -> vector<4x2xf32>
    %c0_44 = arith.constant 0 : index
    %c0_45 = arith.constant 0 : index
    %102 = vector.load %arg16[%c0_44, %c0_45] : memref<4x1xf32, #tpu.memory_space<vmem>>, vector<4x1xf32>
    %103 = vector.broadcast %102 : vector<4x1xf32> to vector<4x2xf32>
    %104 = arith.addf %101, %103 : vector<4x2xf32>
    %cst_46 = arith.constant dense<0xFF800000> : vector<2xf32>
    %105 = vector.multi_reduction <maximumf>, %104, %cst_46 [0] : vector<4x2xf32> to vector<2xf32>
    %106 = vector.shape_cast %105 : vector<2xf32> to vector<1x2xf32>
    %107 = vector.broadcast %106 : vector<1x2xf32> to vector<4x2xf32>
    %108 = arith.subf %104, %107 : vector<4x2xf32>
    %109 = math.exp %108 : vector<4x2xf32>
    %cst_47 = arith.constant dense<0.000000e+00> : vector<2xf32>
    %110 = vector.multi_reduction <add>, %109, %cst_47 [0] : vector<4x2xf32> to vector<2xf32>
    %111 = vector.shape_cast %110 : vector<2xf32> to vector<1x2xf32>
    %112 = vector.broadcast %111 : vector<1x2xf32> to vector<4x2xf32>
    %113 = arith.divf %109, %112 : vector<4x2xf32>
    %114 = vector.extract_strided_slice %113 {offsets = [0, 0], sizes = [4, 1], strides = [1, 1]} : vector<4x2xf32> to vector<4x1xf32>
    %115 = vector.extract_strided_slice %113 {offsets = [0, 1], sizes = [4, 1], strides = [1, 1]} : vector<4x2xf32> to vector<4x1xf32>
    %116 = arith.addf %114, %115 : vector<4x1xf32>
    %cst_48 = arith.constant 0.000000e+00 : f32
    %117 = vector.broadcast %cst_48 : f32 to vector<16x1xf32>
    %118 = vector.extract_strided_slice %91 {offsets = [0, 0], sizes = [8, 2], strides = [1, 1]} : vector<32x2xf32> to vector<8x2xf32>
    %c0_49 = arith.constant 0 : index
    %c0_50 = arith.constant 0 : index
    %c0_51 = arith.constant 0 : index
    %119 = vector.load %arg11[%c0_49, %c0_50, %c0_51] : memref<4x16x8xf32, #tpu.memory_space<vmem>>, vector<1x16x8xf32>
    %120 = vector.shape_cast %119 : vector<1x16x8xf32> to vector<16x8xf32>
    %cst_52 = arith.constant dense<0.000000e+00> : vector<16x2xf32>
    %121 = tpu.matmul %120, %118, %cst_52 {dimension_numbers = #tpu.dot_dimension_numbers<[1], [0], [0], [1], [0, 0, 1, 1], [], []>} : vector<16x8xf32>, vector<8x2xf32>, vector<16x2xf32> -> vector<16x2xf32>
    %c0_53 = arith.constant 0 : index
    %c0_54 = arith.constant 0 : index
    %c0_55 = arith.constant 0 : index
    %122 = vector.load %arg12[%c0_53, %c0_54, %c0_55] : memref<4x16x1xf32, #tpu.memory_space<vmem>>, vector<1x16x1xf32>
    %123 = vector.shape_cast %122 : vector<1x16x1xf32> to vector<16x1xf32>
    %124 = vector.broadcast %123 : vector<16x1xf32> to vector<16x2xf32>
    %125 = arith.addf %121, %124 : vector<16x2xf32>
    %126 = arith.negf %125 : vector<16x2xf32>
    %127 = math.exp %126 : vector<16x2xf32>
    %cst_56 = arith.constant 1.000000e+00 : f32
    %128 = vector.broadcast %cst_56 : f32 to vector<16x2xf32>
    %129 = arith.addf %128, %127 : vector<16x2xf32>
    %130 = arith.divf %128, %129 : vector<16x2xf32>
    %131 = vector.extract_strided_slice %130 {offsets = [0, 0], sizes = [16, 1], strides = [1, 1]} : vector<16x2xf32> to vector<16x1xf32>
    %132 = vector.extract_strided_slice %130 {offsets = [0, 1], sizes = [16, 1], strides = [1, 1]} : vector<16x2xf32> to vector<16x1xf32>
    %133 = arith.addf %131, %132 : vector<16x1xf32>
    %134 = vector.extract_strided_slice %116 {offsets = [0, 0], sizes = [1, 1], strides = [1, 1]} : vector<4x1xf32> to vector<1x1xf32>
    %135 = vector.broadcast %134 : vector<1x1xf32> to vector<16x1xf32>
    %136 = arith.mulf %133, %135 : vector<16x1xf32>
    %137 = arith.addf %117, %136 : vector<16x1xf32>
    %138 = vector.extract_strided_slice %91 {offsets = [8, 0], sizes = [8, 2], strides = [1, 1]} : vector<32x2xf32> to vector<8x2xf32>
    %c1 = arith.constant 1 : index
    %c0_57 = arith.constant 0 : index
    %c0_58 = arith.constant 0 : index
    %139 = vector.load %arg11[%c1, %c0_57, %c0_58] : memref<4x16x8xf32, #tpu.memory_space<vmem>>, vector<1x16x8xf32>
    %140 = vector.shape_cast %139 : vector<1x16x8xf32> to vector<16x8xf32>
    %cst_59 = arith.constant dense<0.000000e+00> : vector<16x2xf32>
    %141 = tpu.matmul %140, %138, %cst_59 {dimension_numbers = #tpu.dot_dimension_numbers<[1], [0], [0], [1], [0, 0, 1, 1], [], []>} : vector<16x8xf32>, vector<8x2xf32>, vector<16x2xf32> -> vector<16x2xf32>
    %c1_60 = arith.constant 1 : index
    %c0_61 = arith.constant 0 : index
    %c0_62 = arith.constant 0 : index
    %142 = vector.load %arg12[%c1_60, %c0_61, %c0_62] : memref<4x16x1xf32, #tpu.memory_space<vmem>>, vector<1x16x1xf32>
    %143 = vector.shape_cast %142 : vector<1x16x1xf32> to vector<16x1xf32>
    %144 = vector.broadcast %143 : vector<16x1xf32> to vector<16x2xf32>
    %145 = arith.addf %141, %144 : vector<16x2xf32>
    %146 = arith.negf %145 : vector<16x2xf32>
    %147 = math.exp %146 : vector<16x2xf32>
    %cst_63 = arith.constant 1.000000e+00 : f32
    %148 = vector.broadcast %cst_63 : f32 to vector<16x2xf32>
    %149 = arith.addf %148, %147 : vector<16x2xf32>
    %150 = arith.divf %148, %149 : vector<16x2xf32>
    %151 = vector.extract_strided_slice %150 {offsets = [0, 0], sizes = [16, 1], strides = [1, 1]} : vector<16x2xf32> to vector<16x1xf32>
    %152 = vector.extract_strided_slice %150 {offsets = [0, 1], sizes = [16, 1], strides = [1, 1]} : vector<16x2xf32> to vector<16x1xf32>
    %153 = arith.addf %151, %152 : vector<16x1xf32>
    %154 = vector.extract_strided_slice %116 {offsets = [1, 0], sizes = [1, 1], strides = [1, 1]} : vector<4x1xf32> to vector<1x1xf32>
    %155 = vector.broadcast %154 : vector<1x1xf32> to vector<16x1xf32>
    %156 = arith.mulf %153, %155 : vector<16x1xf32>
    %157 = arith.addf %137, %156 : vector<16x1xf32>
    %158 = vector.extract_strided_slice %91 {offsets = [16, 0], sizes = [8, 2], strides = [1, 1]} : vector<32x2xf32> to vector<8x2xf32>
    %c2 = arith.constant 2 : index
    %c0_64 = arith.constant 0 : index
    %c0_65 = arith.constant 0 : index
    %159 = vector.load %arg11[%c2, %c0_64, %c0_65] : memref<4x16x8xf32, #tpu.memory_space<vmem>>, vector<1x16x8xf32>
    %160 = vector.shape_cast %159 : vector<1x16x8xf32> to vector<16x8xf32>
    %cst_66 = arith.constant dense<0.000000e+00> : vector<16x2xf32>
    %161 = tpu.matmul %160, %158, %cst_66 {dimension_numbers = #tpu.dot_dimension_numbers<[1], [0], [0], [1], [0, 0, 1, 1], [], []>} : vector<16x8xf32>, vector<8x2xf32>, vector<16x2xf32> -> vector<16x2xf32>
    %c2_67 = arith.constant 2 : index
    %c0_68 = arith.constant 0 : index
    %c0_69 = arith.constant 0 : index
    %162 = vector.load %arg12[%c2_67, %c0_68, %c0_69] : memref<4x16x1xf32, #tpu.memory_space<vmem>>, vector<1x16x1xf32>
    %163 = vector.shape_cast %162 : vector<1x16x1xf32> to vector<16x1xf32>
    %164 = vector.broadcast %163 : vector<16x1xf32> to vector<16x2xf32>
    %165 = arith.addf %161, %164 : vector<16x2xf32>
    %166 = arith.negf %165 : vector<16x2xf32>
    %167 = math.exp %166 : vector<16x2xf32>
    %cst_70 = arith.constant 1.000000e+00 : f32
    %168 = vector.broadcast %cst_70 : f32 to vector<16x2xf32>
    %169 = arith.addf %168, %167 : vector<16x2xf32>
    %170 = arith.divf %168, %169 : vector<16x2xf32>
    %171 = vector.extract_strided_slice %170 {offsets = [0, 0], sizes = [16, 1], strides = [1, 1]} : vector<16x2xf32> to vector<16x1xf32>
    %172 = vector.extract_strided_slice %170 {offsets = [0, 1], sizes = [16, 1], strides = [1, 1]} : vector<16x2xf32> to vector<16x1xf32>
    %173 = arith.addf %171, %172 : vector<16x1xf32>
    %174 = vector.extract_strided_slice %116 {offsets = [2, 0], sizes = [1, 1], strides = [1, 1]} : vector<4x1xf32> to vector<1x1xf32>
    %175 = vector.broadcast %174 : vector<1x1xf32> to vector<16x1xf32>
    %176 = arith.mulf %173, %175 : vector<16x1xf32>
    %177 = arith.addf %157, %176 : vector<16x1xf32>
    %178 = vector.extract_strided_slice %91 {offsets = [24, 0], sizes = [8, 2], strides = [1, 1]} : vector<32x2xf32> to vector<8x2xf32>
    %c3 = arith.constant 3 : index
    %c0_71 = arith.constant 0 : index
    %c0_72 = arith.constant 0 : index
    %179 = vector.load %arg11[%c3, %c0_71, %c0_72] : memref<4x16x8xf32, #tpu.memory_space<vmem>>, vector<1x16x8xf32>
    %180 = vector.shape_cast %179 : vector<1x16x8xf32> to vector<16x8xf32>
    %cst_73 = arith.constant dense<0.000000e+00> : vector<16x2xf32>
    %181 = tpu.matmul %180, %178, %cst_73 {dimension_numbers = #tpu.dot_dimension_numbers<[1], [0], [0], [1], [0, 0, 1, 1], [], []>} : vector<16x8xf32>, vector<8x2xf32>, vector<16x2xf32> -> vector<16x2xf32>
    %c3_74 = arith.constant 3 : index
    %c0_75 = arith.constant 0 : index
    %c0_76 = arith.constant 0 : index
    %182 = vector.load %arg12[%c3_74, %c0_75, %c0_76] : memref<4x16x1xf32, #tpu.memory_space<vmem>>, vector<1x16x1xf32>
    %183 = vector.shape_cast %182 : vector<1x16x1xf32> to vector<16x1xf32>
    %184 = vector.broadcast %183 : vector<16x1xf32> to vector<16x2xf32>
    %185 = arith.addf %181, %184 : vector<16x2xf32>
    %186 = arith.negf %185 : vector<16x2xf32>
    %187 = math.exp %186 : vector<16x2xf32>
    %cst_77 = arith.constant 1.000000e+00 : f32
    %188 = vector.broadcast %cst_77 : f32 to vector<16x2xf32>
    %189 = arith.addf %188, %187 : vector<16x2xf32>
    %190 = arith.divf %188, %189 : vector<16x2xf32>
    %191 = vector.extract_strided_slice %190 {offsets = [0, 0], sizes = [16, 1], strides = [1, 1]} : vector<16x2xf32> to vector<16x1xf32>
    %192 = vector.extract_strided_slice %190 {offsets = [0, 1], sizes = [16, 1], strides = [1, 1]} : vector<16x2xf32> to vector<16x1xf32>
    %193 = arith.addf %191, %192 : vector<16x1xf32>
    %194 = vector.extract_strided_slice %116 {offsets = [3, 0], sizes = [1, 1], strides = [1, 1]} : vector<4x1xf32> to vector<1x1xf32>
    %195 = vector.broadcast %194 : vector<1x1xf32> to vector<16x1xf32>
    %196 = arith.mulf %193, %195 : vector<16x1xf32>
    %197 = arith.addf %177, %196 : vector<16x1xf32>
    %198 = arith.negf %197 : vector<16x1xf32>
    %199 = math.exp %198 : vector<16x1xf32>
    %cst_78 = arith.constant 1.000000e+00 : f32
    %200 = vector.broadcast %cst_78 : f32 to vector<16x1xf32>
    %201 = arith.addf %200, %199 : vector<16x1xf32>
    %202 = arith.divf %200, %201 : vector<16x1xf32>
    %203 = vector.broadcast %202 : vector<16x1xf32> to vector<16x384xf32>
    %204 = arith.mulf %52, %203 : vector<16x384xf32>
    %205 = arith.addf %204, %52 : vector<16x384xf32>
    %206 = arith.truncf %205 : vector<16x384xf32> to vector<16x384xbf16>
    %cst_79 = arith.constant 0.000000e+00 : bf16
    %207 = vector.broadcast %cst_79 : bf16 to vector<16x19xbf16>
    %208 = tpu.concatenate %207, %206, %207 in 1 : vector<16x19xbf16>, vector<16x384xbf16>, vector<16x19xbf16> -> vector<16x422xbf16>
    %209 = vector.extract_strided_slice %208 {offsets = [0, 0], sizes = [16, 384], strides = [1, 1]} : vector<16x422xbf16> to vector<16x384xbf16>
    %210 = vector.extract_strided_slice %208 {offsets = [0, 1], sizes = [16, 384], strides = [1, 1]} : vector<16x422xbf16> to vector<16x384xbf16>
    %211 = vector.extract_strided_slice %208 {offsets = [0, 2], sizes = [16, 384], strides = [1, 1]} : vector<16x422xbf16> to vector<16x384xbf16>
    %212 = vector.extract_strided_slice %208 {offsets = [0, 18], sizes = [16, 384], strides = [1, 1]} : vector<16x422xbf16> to vector<16x384xbf16>
    %213 = vector.extract_strided_slice %208 {offsets = [0, 19], sizes = [16, 384], strides = [1, 1]} : vector<16x422xbf16> to vector<16x384xbf16>
    %214 = vector.extract_strided_slice %208 {offsets = [0, 20], sizes = [16, 384], strides = [1, 1]} : vector<16x422xbf16> to vector<16x384xbf16>
    %215 = vector.extract_strided_slice %208 {offsets = [0, 36], sizes = [16, 384], strides = [1, 1]} : vector<16x422xbf16> to vector<16x384xbf16>
    %216 = vector.extract_strided_slice %208 {offsets = [0, 37], sizes = [16, 384], strides = [1, 1]} : vector<16x422xbf16> to vector<16x384xbf16>
    %217 = vector.extract_strided_slice %208 {offsets = [0, 38], sizes = [16, 384], strides = [1, 1]} : vector<16x422xbf16> to vector<16x384xbf16>
    %218 = tpu.concatenate %209, %210, %211, %212, %213, %214, %215, %216, %217 in 0 : vector<16x384xbf16>, vector<16x384xbf16>, vector<16x384xbf16>, vector<16x384xbf16>, vector<16x384xbf16>, vector<16x384xbf16>, vector<16x384xbf16>, vector<16x384xbf16>, vector<16x384xbf16> -> vector<144x384xbf16>
    %c0_80 = arith.constant 0 : index
    %c0_81 = arith.constant 0 : index
    %219 = vector.load %arg5[%c0_80, %c0_81] : memref<16x144xbf16, #tpu.memory_space<vmem>>, vector<16x144xbf16>
    %cst_82 = arith.constant dense<0.000000e+00> : vector<16x384xf32>
    %220 = tpu.matmul %219, %218, %cst_82 {dimension_numbers = #tpu.dot_dimension_numbers<[1], [0], [0], [1], [0, 0, 1, 1], [], []>} : vector<16x144xbf16>, vector<144x384xbf16>, vector<16x384xf32> -> vector<16x384xf32>
    %221 = vector.broadcast %8 : vector<16x1xf32> to vector<16x384xf32>
    %222 = arith.mulf %220, %221 : vector<16x384xf32>
    %223 = vector.broadcast %9 : vector<16x1xf32> to vector<16x384xf32>
    %224 = arith.addf %222, %223 : vector<16x384xf32>
    %cst_83 = arith.constant 0.000000e+00 : f32
    %225 = vector.broadcast %cst_83 : f32 to vector<16x384xf32>
    %226 = arith.maximumf %224, %225 : vector<16x384xf32>
    %227 = vector.broadcast %0 : vector<1x384xf32> to vector<16x384xf32>
    %228 = arith.mulf %226, %227 : vector<16x384xf32>
    %c0_84 = arith.constant 0 : index
    %c0_85 = arith.constant 0 : index
    %c0_86 = arith.constant 0 : index
    %229 = vector.load %arg17[%c0_84, %c0_85, %c0_86] : memref<1x16x384xf32, #tpu.memory_space<vmem>>, vector<1x16x384xf32>
    %230 = vector.shape_cast %229 : vector<1x16x384xf32> to vector<16x384xf32>
    %231 = vector.shape_cast %228 : vector<16x384xf32> to vector<1x16x384xf32>
    tpu.vector_store %arg17[%c0_84, %c0_85, %c0_86], %231 {strides = array<i32>} : memref<1x16x384xf32, #tpu.memory_space<vmem>>, vector<1x16x384xf32>,
    return
  }
  func.func @transform_0(%arg0: i32) -> (i32, i32, i32) {
    %c0_i32 = arith.constant 0 : i32
    %c0_i32_0 = arith.constant 0 : i32
    %c0_i32_1 = arith.constant 0 : i32
    return %arg0, %c0_i32, %c0_i32_0 : i32, i32, i32
  }
  func.func @transform_1(%arg0: i32) -> (i32, i32) {
    %c0_i32 = arith.constant 0 : i32
    %c0_i32_0 = arith.constant 0 : i32
    %c0_i32_1 = arith.constant 0 : i32
    return %c0_i32, %c0_i32_0 : i32, i32
  }
  func.func @transform_2(%arg0: i32) -> (i32, i32) {
    %c0_i32 = arith.constant 0 : i32
    %c0_i32_0 = arith.constant 0 : i32
    %c0_i32_1 = arith.constant 0 : i32
    return %c0_i32, %c0_i32_0 : i32, i32
  }
  func.func @transform_3(%arg0: i32) -> (i32, i32) {
    %c0_i32 = arith.constant 0 : i32
    %c0_i32_0 = arith.constant 0 : i32
    %c0_i32_1 = arith.constant 0 : i32
    return %c0_i32, %c0_i32_0 : i32, i32
  }
  func.func @transform_4(%arg0: i32) -> (i32, i32) {
    %c0_i32 = arith.constant 0 : i32
    %c0_i32_0 = arith.constant 0 : i32
    %c0_i32_1 = arith.constant 0 : i32
    return %c0_i32, %c0_i32_0 : i32, i32
  }
  func.func @transform_5(%arg0: i32) -> (i32, i32) {
    %c0_i32 = arith.constant 0 : i32
    %c0_i32_0 = arith.constant 0 : i32
    %c0_i32_1 = arith.constant 0 : i32
    return %c0_i32, %c0_i32_0 : i32, i32
  }
  func.func @transform_6(%arg0: i32) -> (i32, i32) {
    %c0_i32 = arith.constant 0 : i32
    %c0_i32_0 = arith.constant 0 : i32
    %c0_i32_1 = arith.constant 0 : i32
    return %c0_i32, %c0_i32_0 : i32, i32
  }
  func.func @transform_7(%arg0: i32) -> (i32, i32) {
    %c0_i32 = arith.constant 0 : i32
    %c0_i32_0 = arith.constant 0 : i32
    %c0_i32_1 = arith.constant 0 : i32
    return %c0_i32, %c0_i32_0 : i32, i32
  }
  func.func @transform_8(%arg0: i32) -> (i32, i32) {
    %c0_i32 = arith.constant 0 : i32
    %c0_i32_0 = arith.constant 0 : i32
    %c0_i32_1 = arith.constant 0 : i32
    return %c0_i32, %c0_i32_0 : i32, i32
  }
  func.func @transform_9(%arg0: i32) -> (i32, i32) {
    %c0_i32 = arith.constant 0 : i32
    %c0_i32_0 = arith.constant 0 : i32
    %c0_i32_1 = arith.constant 0 : i32
    return %c0_i32, %c0_i32_0 : i32, i32
  }
  func.func @transform_10(%arg0: i32) -> (i32, i32, i32) {
    %c0_i32 = arith.constant 0 : i32
    %c0_i32_0 = arith.constant 0 : i32
    %c0_i32_1 = arith.constant 0 : i32
    %c0_i32_2 = arith.constant 0 : i32
    return %c0_i32, %c0_i32_0, %c0_i32_1 : i32, i32, i32
  }
  func.func @transform_11(%arg0: i32) -> (i32, i32, i32) {
    %c0_i32 = arith.constant 0 : i32
    %c0_i32_0 = arith.constant 0 : i32
    %c0_i32_1 = arith.constant 0 : i32
    %c0_i32_2 = arith.constant 0 : i32
    return %c0_i32, %c0_i32_0, %c0_i32_1 : i32, i32, i32
  }
  func.func @transform_12(%arg0: i32) -> (i32, i32) {
    %c0_i32 = arith.constant 0 : i32
    %c0_i32_0 = arith.constant 0 : i32
    %c0_i32_1 = arith.constant 0 : i32
    return %c0_i32, %c0_i32_0 : i32, i32
  }
  func.func @transform_13(%arg0: i32) -> (i32, i32) {
    %c0_i32 = arith.constant 0 : i32
    %c0_i32_0 = arith.constant 0 : i32
    %c0_i32_1 = arith.constant 0 : i32
    return %c0_i32, %c0_i32_0 : i32, i32
  }
  func.func @transform_14(%arg0: i32) -> (i32, i32) {
    %c0_i32 = arith.constant 0 : i32
    %c0_i32_0 = arith.constant 0 : i32
    %c0_i32_1 = arith.constant 0 : i32
    return %c0_i32, %c0_i32_0 : i32, i32
  }
  func.func @transform_15(%arg0: i32) -> (i32, i32) {
    %c0_i32 = arith.constant 0 : i32
    %c0_i32_0 = arith.constant 0 : i32
    %c0_i32_1 = arith.constant 0 : i32
    return %c0_i32, %c0_i32_0 : i32, i32
  }
  func.func @transform_16(%arg0: i32) -> (i32, i32, i32) {
    %c0_i32 = arith.constant 0 : i32
    %c0_i32_0 = arith.constant 0 : i32
    %c0_i32_1 = arith.constant 0 : i32
    return %arg0, %c0_i32, %c0_i32_0 : i32, i32, i32
  }
}

</mosaic_0001>

<bundles_post_ra>
// kernel: domain_se_conv_block.1
= control target key start
LH: loop header
LB: loop body
LE: loop exit
PB: predicated region body
PF: predicated region fallthrough
CT: control target
= control target key end

     0   :  { %s2933_s21 = smov 0   ;;  %s3541_s0 = inlined_call_operand.vmem [shape: bf16[2,4,384], index: 0, kind: input, shape index: {}]   ;;  %s3542_s1 = inlined_call_operand.vmem [shape: f32[1,384], index: 1, kind: input, shape index: {}]   ;;  %s3543_s2 = inlined_call_operand.vmem [shape: bf16[16,36], index: 2, kind: input, shape index: {}]   ;;  %s3544_s3 = inlined_call_operand.vmem [shape: bf16[16,144], index: 3, kind: input, shape index: {}]   ;;  %s3545_s4 = inlined_call_operand.vmem [shape: bf16[16,144], index: 4, kind: input, shape index: {}]   ;;  %s3546_s5 = inlined_call_operand.vmem [shape: f32[16,6], index: 5, kind: input, shape index: {}]   ;;  %s3547_s6 = inlined_call_operand.vmem [shape: f32[4,16], index: 6, kind: input, shape index: {}]   ;;  %s3548_s7 = inlined_call_operand.vmem [shape: f32[4,1], index: 7, kind: input, shape index: {}]   ;;  %s3549_s8 = inlined_call_operand.vmem [shape: f32[32,16], index: 8, kind: input, shape index: {}]   ;;  %s3550_s9 = inlined_call_operand.vmem [shape: f32[32,1], index: 9, kind: input, shape index: {}]   ;;  %s3551_s10 = inlined_call_operand.vmem [shape: f32[4,16,8], index: 10, kind: input, shape index: {}]   ;;  %s3552_s11 = inlined_call_operand.vmem [shape: f32[4,16,1], index: 11, kind: input, shape index: {}]   ;;  %s3553_s12 = inlined_call_operand.vmem [shape: f32[2,4], index: 12, kind: input, shape index: {}]   ;;  %s3554_s13 = inlined_call_operand.vmem [shape: f32[2,1], index: 13, kind: input, shape index: {}]   ;;  %s3555_s14 = inlined_call_operand.vmem [shape: f32[4,2], index: 14, kind: input, shape index: {}]   ;;  %s3556_s15 = inlined_call_operand.vmem [shape: f32[4,1], index: 15, kind: input, shape index: {}]   ;;  %s3557_s16 = inlined_call_operand.vmem [shape: f32[2,16,384], index: 16, kind: output, shape index: {}]  }
   0x1   :  { %3571 = sst [smem:[#allocation2_spill]] %s3541_s0 }
   0x2 LB: > { %s2564_s22 = sadd.s32 4294967295, %s2827_s21   ;;  %p2568_p0 = scmp.ge.s32.totalorder %s2827_s21, 1  ;;  %s2827_s21 = sphi %s2933_s21, %s26_s21  }
   0x3   : > { %p462_p1 = scmp.lt.s32.totalorder %s2827_s21, 3 }
   0x5   : > { %p463_p2 = pnand %p2568_p0, %p462_p1 }
   0x6   : > { %p512_p3 = scmp.lt.s32.totalorder (!%p463_p2), %s2564_s22, 1  ;;  %v532_v0 = vlaneseq (!%p463_p2)  ;;  %v2829_v1 = vmov (!%p463_p2), 1983009808   ;;  %s3572_s26 = sld [smem:[#allocation2_spill]] (!%p463_p2)  ;;  %vm550_vm0 = vcmask (!%p463_p2), 154624   ;;  %v2837_v26 = vmov (!%p463_p2), 0.0  }
   0x7   : > { %466 = sbr.rel (%p463_p2) target bundleno = 2730 (0xaaa), region = 84  ;;  %v530_v2 = vunpack.c.l.s4 (!%p463_p2), %v2829_v1  ;;  %s2830_s28 = smov (!%p463_p2), 19   ;;  %2658 = vmatprep.subr.bf16.mxu1 (!%p463_p2), %v2837_v26  ;;  %v2840_v31 = vmov (!%p463_p2), 0   ;;  %vm2841_vm1 = vmmov (!%p463_p2), 0   ;;  %v3018_v32 = vld [vmem:[%s3546_s5] sm:$0xff] (!%p463_p2)  ;;  %v3025_v33 = vld [vmem:[%s3546_s5 + $0x8] sm:$0xff] (!%p463_p2)  ;;  %vm3128_vm14 = vmneg (!%p463_p2), %vm550_vm0 }
   0x8   : > { %v2943_v3 = vshrl.u32 (!%p463_p2), %v532_v0, 7  ;;  %s3567_s29 = smov (!%p463_p2), 109   ;;  %s2832_s30 = smov (!%p463_p2), 127   ;;  %771 = vmatprep.mubr.bf16.mxu0 (!%p463_p2), %v2840_v31  ;;  %2755 = vset.pattern.permute.xlu1 (!%p463_p2), %v2840_v31  ;;  %v2842_v34 = vmov (!%p463_p2), 1   ;;  %vm573_vm2 = vcmask (!%p463_p2), 1039360   ;;  %vm589_vm3 = vcmask (!%p463_p2), 1031168  }
   0x9   : > { %v531_v4 = vunpack.c.0.s8 (!%p463_p2), %v530_v2  ;;  %s2833_s0 = smov (!%p463_p2), 126   ;;  %s3565_s17 = smov (!%p463_p2), 108   ;;  %2664 = vmatprep.mubr.msk.bf16.mxu1 (!%p463_p2), %vm2841_vm1, %v2837_v26  ;;  %2756 = vset.pattern.permute.xlu0 (!%p463_p2), %v2840_v31  ;;  %vm669_vm4 = vcmask (!%p463_p2), 1041408   ;;  %vm678_vm5 = vcmask (!%p463_p2), 1043456   ;;  %vm605_vm6 = vcmask (!%p463_p2), 900096  }
   0xa   : > { %s3569_s18 = smov (!%p463_p2), 110   ;;  %s3563_s19 = smov (!%p463_p2), 92   ;;  %vm685_vm7 = vcmask (!%p463_p2), 1045504   ;;  %vm629_vm8 = vcmask (!%p463_p2), 883712   ;;  %vm641_vm9 = vcmask (!%p463_p2), 752640   ;;  %vm617_vm10 = vcmask (!%p463_p2), 891904  }
   0xb   : > { %v534_v5 = vsub.s32 (!%p463_p2), %v531_v4, %v2943_v3  ;;  %s3561_s20 = smov (!%p463_p2), 91   ;;  %vm653_vm11 = vcmask (!%p463_p2), 744448   ;;  %vm3558_vm12 = vcmask (!%p463_p2), 736256   ;;  %vm726_vm13 = vcmask (!%p463_p2), 293888   ;;  %s3586_s25 = smov (!%p463_p2), 90  }
   0xc   : > { %vm1027_vm15 = vcmask (!%p463_p2), 130048  }
   0xe   : > { %s3591_s22 = smov (!%p512_p3, %s2564_s22), 1 }
   0xf   : > { %s2726_s23 = smul.u32 6, %s3591_s22 }
  0x11   : > { %s516_s27 = scalar_lea.vmem %s3572_s26, %s2726_s23  ;;  %s3559_s23 = smov 90  }
  0x12   : > { %v524_v6 = vld [vmem:[%s516_s27] sm:$0x3f] }
  0x13   : > { %v535_v7 = vrot.slane %v524_v6, %v534_v5  ;;  %v528_v8 = vcombine.high %v524_v6, %v524_v6 }
  0x15   : > { %544 = vrot.lane.b32.xlu0 %v535_v7, %s2830_s28  ;;  %v543_v9 = vcombine.high %v535_v7, %v535_v7  ;;  %v542_v10 = vrot.slane %v528_v8, %v534_v5 }
  0x17   : > { %548 = vrot.lane.b32.xlu1 %v542_v10, %s2830_s28 }
  0x19   : > { %546 = vrot.lane.b32.xlu0 %v543_v9, %s2830_s28 }
  0x87   : > { %v545_v11 = vpop.permute.xlu0 %544 }
  0x88   : > { %v2954_v12 = vsel %vm550_vm0, 0, %v545_v11 }
  0x89   : > { %609 = vrot.lane.b32.xlu1 %v2954_v12, %s3567_s29  ;;  %v549_v13 = vpop.permute.xlu1 %548  ;;  %v561_v15 = vrot.slane %v2954_v12, 6  ;;  %v577_v17 = vrot.slane %v2954_v12, 4  ;;  %v593_v18 = vrot.slane %v2954_v12, 2 }
  0x8a   : > { %v558_v22 = vsel %vm550_vm0, %v549_v13, 0 }
  0x8b   : > { %v547_v14 = vpop.permute.xlu0 %546  ;;  %v564_v23 = vrot.slane %v558_v22, 6  ;;  %v580_v25 = vrot.slane %v558_v22, 4  ;;  %v596_v28 = vrot.slane %v558_v22, 2 }
  0x8c   : > { %v2960_v16 = vsel %vm550_vm0, %v547_v14, %v549_v13  ;;  %v2971_v20 = vsel %vm550_vm0, %v545_v11, %v547_v14 }
  0x8d   : > { %565 = vrot.lane.b32.xlu1 %v561_v15, %s2832_s30  ;;  %613 = vrot.lane.b32.xlu0 %v2960_v16, %s3567_s29  ;;  %v563_v19 = vrot.slane %v2960_v16, 6  ;;  %v578_v21 = vrot.slane %v2971_v20, 4  ;;  %v594_v24 = vrot.slane %v2971_v20, 2  ;;  %v562_v27 = vrot.slane %v2971_v20, 6 }
  0x8e   : > { %v579_v29 = vrot.slane %v2960_v16, 4  ;;  %v595_v30 = vrot.slane %v2960_v16, 2 }
  0x91   : > { %581 = vrot.lane.b32.xlu1 %v577_v17, %s2833_s0  ;;  %621 = vrot.lane.b32.xlu0 %v561_v15, %s3565_s17 }
  0x95   : > { %597 = vrot.lane.b32.xlu1 %v593_v18, %s3569_s18  ;;  %569 = vrot.lane.b32.xlu0 %v563_v19, %s2832_s30 }
  0x99   : > { %611 = vrot.lane.b32.xlu1 %v2971_v20, %s3567_s29  ;;  %583 = vrot.lane.b32.xlu0 %v578_v21, %s2833_s0 }
  0x9d   : > { %615 = vrot.lane.b32.xlu1 %v558_v22, %s3567_s29  ;;  %571 = vrot.lane.b32.xlu0 %v564_v23, %s2832_s30 }
  0xa1   : > { %633 = vrot.lane.b32.xlu1 %v577_v17, %s3563_s19  ;;  %599 = vrot.lane.b32.xlu0 %v594_v24, %s3569_s18 }
  0xa5   : > { %645 = vrot.lane.b32.xlu1 %v593_v18, %s3561_s20  ;;  %587 = vrot.lane.b32.xlu0 %v580_v25, %s2833_s0 }
  0xa9   : > { %567 = vrot.lane.b32.xlu1 %v562_v27, %s2832_s30  ;;  %603 = vrot.lane.b32.xlu0 %v596_v28, %s3569_s18 }
  0xad   : > { %585 = vrot.lane.b32.xlu1 %v579_v29, %s2833_s0  ;;  %625 = vrot.lane.b32.xlu0 %v563_v19, %s3565_s17 }
  0xb1   : > { %601 = vrot.lane.b32.xlu1 %v595_v30, %s3569_s18  ;;  %637 = vrot.lane.b32.xlu0 %v579_v29, %s3563_s19 }
  0xb5   : > { %623 = vrot.lane.b32.xlu1 %v562_v27, %s3565_s17  ;;  %627 = vrot.lane.b32.xlu0 %v564_v23, %s3565_s17 }
  0xb9   : > { %635 = vrot.lane.b32.xlu1 %v578_v21, %s3563_s19  ;;  %647 = vrot.lane.b32.xlu0 %v594_v24, %s3561_s20 }
  0xbd   : > { %649 = vrot.lane.b32.xlu1 %v595_v30, %s3561_s20  ;;  %659 = vrot.lane.b32.xlu0 %v2971_v20, %s3559_s23 }
  0xc1   : > { %657 = vrot.lane.b32.xlu1 %v2954_v12, %s3559_s23  ;;  %639 = vrot.lane.b32.xlu0 %v580_v25, %s3563_s19 }
  0xc5   : > { %661 = vrot.lane.b32.xlu1 %v2960_v16, %s3559_s23  ;;  %651 = vrot.lane.b32.xlu0 %v596_v28, %s3561_s20 }
  0xc9   : > { %663 = vrot.lane.b32.xlu0 %v558_v22, %s3559_s23  ;;  %825 = vperm.xlu1 %2755, %v3018_v32  }
  0xcd   : > { %2757 = vset.pattern.permute.xlu1 %v2842_v34  ;;  %830 = vperm.xlu0 %2756, %v3025_v33  }
  0xce   : > { %840 = vperm.xlu1 %2757, %v3018_v32  }
  0xd2   : > { %844 = vperm.xlu1 %2757, %v3025_v33  }
  0xfb   : > { %v610_v35 = vpop.permute.xlu1 %609 }
  0xff   : > { %v3030_v36 = vpop.permute.xlu0 %613  ;;  %v566_v37 = vpop.permute.xlu1 %565 }
 0x103   : > { %v622_v38 = vpop.permute.xlu0 %621  ;;  %v582_v39 = vpop.permute.xlu1 %581 }
 0x107   : > { %v570_v40 = vpop.permute.xlu0 %569  ;;  %v598_v41 = vpop.permute.xlu1 %597 }
 0x10b   : > { %v584_v42 = vpop.permute.xlu0 %583  ;;  %v612_v43 = vpop.permute.xlu1 %611 }
 0x10c   : > { %v590_v60 = vsel %vm589_vm3, %v582_v39, %v584_v42  ;;  %v618_v18 = vsel %vm617_vm10, %v610_v35, %v612_v43 }
 0x10f   : > { %v572_v44 = vpop.permute.xlu0 %571  ;;  %v3032_v45 = vpop.permute.xlu1 %615 }
 0x110   : > { %v576_v55 = vsel %vm573_vm2, %v570_v40, %v572_v44 }
 0x111   : > { %v677_v61 = vsel %vm669_vm4, %v2960_v16, %v576_v55 }
 0x113   : > { %v600_v46 = vpop.permute.xlu0 %599  ;;  %v634_v47 = vpop.permute.xlu1 %633 }
 0x114   : > { %v606_v9 = vsel %vm605_vm6, %v598_v41, %v600_v46 }
 0x117   : > { %v588_v48 = vpop.permute.xlu0 %587  ;;  %v646_v49 = vpop.permute.xlu1 %645 }
 0x11b   : > { %v604_v50 = vpop.permute.xlu0 %603  ;;  %v568_v51 = vpop.permute.xlu1 %567 }
 0x11c   : > { %v574_v52 = vsel %vm573_vm2, %v566_v37, %v568_v51  ;;  %v575_v56 = vsel %vm573_vm2, %v568_v51, %v570_v40  ;;  %v620_v40 = vsel %vm617_vm10, %v3030_v36, %v3032_v45 }
 0x11d   : > { %v671_v57 = vsel %vm669_vm4, %v2954_v12, %v574_v52  ;;  %v674_v0 = vsel %vm669_vm4, %v2971_v20, %v575_v56  ;;  %v619_v20 = vsel %vm617_vm10, %v612_v43, %v3030_v36  ;;  %v2768_v36 = vld [vmem:[%s3543_s2] sm:$0xff]  }
 0x11e   : > { %v680_v1 = vsel %vm678_vm5, %v671_v57, %v590_v60  ;;  %v3092_v57 = vsub.s32 0, %v2943_v3  ;;  %v3095_v60 = vsub.s32 1, %v2943_v3 }
 0x11f   : > { %v626_v53 = vpop.permute.xlu0 %625  ;;  %v586_v54 = vpop.permute.xlu1 %585  ;;  %v687_v10 = vsel %vm685_vm7, %v680_v1, %v606_v9 }
 0x120   : > { %v591_v58 = vsel %vm589_vm3, %v584_v42, %v586_v54  ;;  %v592_v59 = vsel %vm589_vm3, %v586_v54, %v588_v48 }
 0x121   : > { %v682_v4 = vsel %vm678_vm5, %v674_v0, %v591_v58  ;;  %v684_v6 = vsel %vm678_vm5, %v677_v61, %v592_v59  ;;  %v3100_v61 = vld [vmem:[%s3542_s1] sm:$0x7] }
 0x123   : > { %v638_v62 = vpop.permute.xlu0 %637  ;;  %v602_v63 = vpop.permute.xlu1 %601 }
 0x124   : > { %v607_v2 = vsel %vm605_vm6, %v600_v46, %v602_v63  ;;  %v608_v5 = vsel %vm605_vm6, %v602_v63, %v604_v50 }
 0x125   : > { %v690_v7 = vsel %vm685_vm7, %v682_v4, %v607_v2  ;;  %v693_v8 = vsel %vm685_vm7, %v684_v6, %v608_v5  ;;  %v3103_v4 = vsub.s32 2, %v2943_v3 }
 0x126   : > { %739 = vmatprep.subr.bf16.mxu0 %v690_v7  ;;  %2659 = vmatpush3.bf16.msra.mxu1 %v693_v8 }
 0x127   : > { %v628_v11 = vpop.permute.xlu0 %627  ;;  %740 = vmatpush1.bf16.msra.mxu0 %v687_v10  ;;  %v624_v12 = vpop.permute.xlu1 %623  ;;  %2660 = vmatprep.subr.bf16.mxu1 %v2837_v26  ;;  %v3107_v10 = vrot.slane %v3100_v61, %v3092_v57 }
 0x128   : > { %v630_v13 = vsel %vm629_vm8, %v622_v38, %v624_v12  ;;  %v631_v16 = vsel %vm629_vm8, %v624_v12, %v626_v53  ;;  %v632_v38 = vsel %vm629_vm8, %v626_v53, %v628_v11 }
 0x129   : > { %v697_v21 = vsel %vm669_vm4, %v618_v18, %v630_v13  ;;  %v700_v22 = vsel %vm669_vm4, %v619_v20, %v631_v16  ;;  %v703_v42 = vsel %vm669_vm4, %v620_v40, %v632_v38 }
 0x12b   : > { %v648_v14 = vpop.permute.xlu0 %647  ;;  %v636_v15 = vpop.permute.xlu1 %635 }
 0x12c   : > { %v642_v17 = vsel %vm641_vm9, %v634_v47, %v636_v15  ;;  %v643_v19 = vsel %vm641_vm9, %v636_v15, %v638_v62  ;;  %v654_v23 = vsel %vm653_vm11, %v646_v49, %v648_v14  ;;  %v3111_v15 = vrot.slane %v3100_v61, %v3095_v60 }
 0x12d   : > { %v705_v27 = vsel %vm678_vm5, %v697_v21, %v642_v17  ;;  %v707_v29 = vsel %vm678_vm5, %v700_v22, %v643_v19 }
 0x12e   : > { %v711_v34 = vsel %vm685_vm7, %v705_v27, %v654_v23  ;;  %v3115_v23 = vrot.slane %v3100_v61, %v3103_v4 }
 0x12f   : > { %v660_v24 = vpop.permute.xlu0 %659  ;;  %v650_v25 = vpop.permute.xlu1 %649 }
 0x130   : > { %v655_v28 = vsel %vm653_vm11, %v648_v14, %v650_v25 }
 0x131   : > { %v714_v30 = vsel %vm685_vm7, %v707_v29, %v655_v28 }
 0x132   : > { %741 = vmatprep.subr.bf16.mxu0 %v714_v30 }
 0x133   : > { %v640_v35 = vpop.permute.xlu0 %639  ;;  %742 = vmatpush1.bf16.msra.mxu0 %v711_v34  ;;  %v658_v37 = vpop.permute.xlu1 %657 }
 0x134   : > { %v644_v39 = vsel %vm641_vm9, %v638_v62, %v640_v35  ;;  %v666_v41 = vsel %vm3558_vm12, %v658_v37, %v660_v24 }
 0x135   : > { %v709_v48 = vsel %vm678_vm5, %v703_v42, %v644_v39  ;;  %v731_v49 = vsel %vm669_vm4, %v666_v41, 0 }
 0x137   : > { %v652_v43 = vpop.permute.xlu0 %651  ;;  %v662_v44 = vpop.permute.xlu1 %661 }
 0x138   : > { %v656_v46 = vsel %vm653_vm11, %v650_v25, %v652_v43  ;;  %v667_v47 = vsel %vm3558_vm12, %v660_v24, %v662_v44 }
 0x139   : > { %2572 = vmatprep.subr.msk.bf16.mxu0 %vm669_vm4, %v667_v47  ;;  %v717_v50 = vsel %vm685_vm7, %v709_v48, %v656_v46  ;;  %vm1159_vm7 = vcmp.gt.f32.partialorder %v3100_v61, 0.5  ;;  %v2614_v61 = vld [vmem:[%s3552_s11 + $0x38] sm:$0xff] }
 0x13a   : > { %744 = vmatpush1.bf16.msra.mxu0 %v731_v49  ;;  %2661 = vmatpush3.bf16.msra.mxu1 %v717_v50  ;;  %v2769_v50 = vld [vmem:[%s3544_s3 + $0x4] ss:$8 sps:$4 sm:$0xff]  }
 0x13b   : > { %v664_v45 = vpop.permute.xlu0 %663  ;;  %2662 = vmatprep.subr.bf16.mxu1 %v2837_v26 }
 0x13c   : > { %v668_v51 = vsel %vm3558_vm12, %v662_v44, %v664_v45  ;;  %v2844_v45 = vmov 3   ;;  %v2772_v44 = vld [vmem:[%s3545_s4 + $0x4] ss:$8 sps:$4 sm:$0xff]  }
 0x13d   : > { %2573 = vmatmul.mubr.msk.bf16.vlgmr.msra.gmra.mrb[0].mxu0 %vm726_vm13, %v2768_v36  ;;  %v737_v52 = vsel %vm669_vm4, %v668_v51, 0 }
 0x13e   : > { %2663 = vmatpush3.bf16.msra.mxu1 %v737_v52  ;;  %2579 = vmatprep.mubr.msk.bf16.mxu0 %vm1027_vm15, %v2769_v50 }
 0x13f   : > { %1074 = vmatprep.subr.bf16.mxu1 %v2840_v31 }
 0x141   : > { %2665 = vmatmul.mubr.msk.bf16.vlgmr.msra.gmra.mrb[0].mxu1 %vm726_vm13, %v2768_v36  ;;  %v2843_v36 = vmov 2  }
 0x142   : > { %2580 = vmatprep.mubr.msk.bf16.mxu1 %vm1027_vm15, %v2769_v50  ;;  %2758 = vset.pattern.permute.xlu1 %v2843_v36 }
 0x143   : > { %2759 = vset.pattern.permute.xlu0 %v2843_v36 }
 0x148   : > { %v826_v53 = vpop.permute.xlu1 %825 }
 0x14c   : > { %v831_v56 = vpop.permute.xlu0 %830 }
 0x14d   : > { %v841_v54 = vpop.permute.xlu1 %840 }
 0x151   : > { %v845_v5 = vpop.permute.xlu1 %844 }
 0x210   : > { %v773_v55 = vpop.f32.mrb[0].mxu0 }
 0x211   : > { %v833_v58 = vmul.f32 %v826_v53, %v773_v55  ;;  %v775_v59 = vpop.f32.mrb[1].mxu0 }
 0x212   : > { %v834_v62 = vmul.f32 %v826_v53, %v775_v59  ;;  %v777_v63 = vpop.f32.mrb[2].mxu0 }
 0x213   : > { %v847_v0 = vadd.f32 %v841_v54, %v833_v58  ;;  %v836_v1 = vmul.f32 %v831_v56, %v777_v63  ;;  %v779_v2 = vpop.f32.mrb[3].mxu0 }
 0x214   : > { %v848_v6 = vadd.f32 %v841_v54, %v834_v62  ;;  %v837_v7 = vmul.f32 %v831_v56, %v779_v2  ;;  %v816_v8 = vpop.f32.mrb[0].mxu1 }
 0x215   : > { %v853_v9 = vmax.f32 %v847_v0, 0.0  ;;  %v850_v11 = vadd.f32 %v845_v5, %v836_v1  ;;  %v835_v12 = vmul.f32 %v826_v53, %v816_v8  ;;  %v2666_v13 = vpop.f32.mrb[1].mxu1 }
 0x216   : > { %v854_v14 = vmax.f32 %v848_v6, 0.0  ;;  %v851_v16 = vadd.f32 %v845_v5, %v837_v7  ;;  %v819_v17 = vpop.f32.mrb[2].mxu1 }
 0x217   : > { %v856_v18 = vmax.f32 %v850_v11, 0.0  ;;  %v849_v19 = vadd.f32 %v841_v54, %v835_v12  ;;  %v838_v20 = vmul.f32 %v831_v56, %v819_v17  ;;  %v2667_v21 = vpop.f32.mrb[3].mxu1  ;;  %v875_v24 = vmul.f32 %v3107_v10, %v853_v9 }
 0x218   : > { %v857_v22 = vmax.f32 %v851_v16, 0.0  ;;  %v876_v29 = vmul.f32 %v3111_v15, %v854_v14 }
 0x219   : > { %v878_v25 = vmul.f32 %v3107_v10, %v856_v18  ;;  %v855_v27 = vmax.f32 %v849_v19, 0.0  ;;  %v852_v28 = vadd.f32 %v845_v5, %v838_v20 }
 0x21a   : > { %v879_v30 = vmul.f32 %v3111_v15, %v857_v22 }
 0x21b   : > { %v858_v34 = vmax.f32 %v852_v28, 0.0  ;;  %v881_v35 = vpack.c.bf16 %v878_v25, %v875_v24  ;;  %v877_v38 = vmul.f32 %v3115_v23, %v855_v27 }
 0x21c   : > { %v882_v37 = vpack.c.bf16 %v879_v30, %v876_v29 }
 0x21d   : > { %v880_v39 = vmul.f32 %v3115_v23, %v858_v34  ;;  %887 = vrot.lane.b32.xlu0 %v881_v35, %s2830_s28 }
 0x21e   : > { %889 = vrot.lane.b32.xlu1 %v882_v37, %s2830_s28 }
 0x21f   : > { %v883_v40 = vpack.c.bf16 %v880_v39, %v877_v38 }
 0x221   : > { %891 = vrot.lane.b32.xlu0 %v883_v40, %s2830_s28 }
 0x28f   : > { %v888_v41 = vpop.permute.xlu0 %887 }
 0x290   : > { %v898_v42 = vsel %vm550_vm0, 0, %v888_v41  ;;  %v890_v43 = vpop.permute.xlu1 %889 }
 0x291   : > { %v893_v46 = vsel %vm550_vm0, %v888_v41, %v890_v43  ;;  %918 = vrot.lane.b32.xlu0 %v898_v42, %s2833_s0 }
 0x292   : > { %1031 = vmatprep.subr.bf16.mxu0 %v893_v46 }
 0x293   : > { %2578 = vmatpush1.bf16.msk.msra.mxu0 %vm3128_vm14, %v888_v41  ;;  %v892_v47 = vpop.permute.xlu0 %891 }
 0x294   : > { %v894_v48 = vsel %vm550_vm0, %v890_v43, %v892_v47  ;;  %v901_v49 = vsel %vm550_vm0, %v892_v47, 0 }
 0x295   : > { %932 = vrot.lane.b32.xlu0 %v898_v42, %s3569_s18  ;;  %910 = vrot.lane.b32.xlu1 %v901_v49, %s2832_s30 }
 0x296   : > { %1075 = vmatpush1.bf16.msra.mxu1 %v894_v48 }
 0x297   : > { %1076 = vmatprep.subr.bf16.mxu1 %v2840_v31 }
 0x299   : > { %946 = vrot.lane.b32.xlu0 %v898_v42, %s3567_s29  ;;  %924 = vrot.lane.b32.xlu1 %v901_v49, %s2833_s0 }
 0x29d   : > { %960 = vrot.lane.b32.xlu0 %v898_v42, %s3565_s17  ;;  %938 = vrot.lane.b32.xlu1 %v901_v49, %s3569_s18 }
 0x2a1   : > { %974 = vrot.lane.b32.xlu0 %v898_v42, %s3563_s19  ;;  %952 = vrot.lane.b32.xlu1 %v901_v49, %s3567_s29 }
 0x2a5   : > { %988 = vrot.lane.b32.xlu0 %v898_v42, %s3561_s20  ;;  %966 = vrot.lane.b32.xlu1 %v901_v49, %s3565_s17 }
 0x2a9   : > { %980 = vrot.lane.b32.xlu1 %v901_v49, %s3563_s19  ;;  %908 = vrot.lane.b32.xlu0 %v894_v48, %s2832_s30 }
 0x2ad   : > { %904 = vrot.lane.b32.xlu1 %v898_v42, %s2832_s30  ;;  %920 = vrot.lane.b32.xlu0 %v893_v46, %s2833_s0 }
 0x2b1   : > { %906 = vrot.lane.b32.xlu1 %v893_v46, %s2832_s30  ;;  %934 = vrot.lane.b32.xlu0 %v893_v46, %s3569_s18 }
 0x2b5   : > { %922 = vrot.lane.b32.xlu1 %v894_v48, %s2833_s0  ;;  %948 = vrot.lane.b32.xlu0 %v893_v46, %s3567_s29 }
 0x2b9   : > { %936 = vrot.lane.b32.xlu1 %v894_v48, %s3569_s18  ;;  %962 = vrot.lane.b32.xlu0 %v893_v46, %s3565_s17 }
 0x2bd   : > { %950 = vrot.lane.b32.xlu1 %v894_v48, %s3567_s29  ;;  %976 = vrot.lane.b32.xlu0 %v893_v46, %s3563_s19 }
 0x2c1   : > { %964 = vrot.lane.b32.xlu1 %v894_v48, %s3565_s17  ;;  %990 = vrot.lane.b32.xlu0 %v893_v46, %s3561_s20  ;;  %s3582_s17 = smov 109  }
 0x2c5   : > { %978 = vrot.lane.b32.xlu1 %v894_v48, %s3563_s19  ;;  %1004 = vrot.lane.b32.xlu0 %v893_v46, %s3559_s23  ;;  %s3585_s19 = smov 91  }
 0x2c9   : > { %992 = vrot.lane.b32.xlu1 %v894_v48, %s3561_s20  ;;  %1002 = vrot.lane.b32.xlu0 %v898_v42, %s3559_s23 }
 0x2cd   : > { %1006 = vrot.lane.b32.xlu1 %v894_v48, %s3559_s23  ;;  %1008 = vrot.lane.b32.xlu0 %v901_v49, %s3559_s23 }
 0x2d1   : > { %994 = vrot.lane.b32.xlu1 %v901_v49, %s3561_s20  ;;  %1120 = vperm.xlu0 %2759, %v3025_v33  }
 0x2d5   : > { %1116 = vperm.xlu1 %2758, %v3018_v32   ;;  %2761 = vset.pattern.permute.xlu0 %v2840_v31 }
 0x2d9   : > { %2760 = vset.pattern.permute.xlu1 %v2844_v45  ;;  %v2771_v45 = vld [vmem:[%s3544_s3] ss:$8 sps:$4 sm:$0xff]  }
 0x2da   : > { %1130 = vperm.xlu1 %2760, %v3018_v32  }
 0x2de   : > { %1134 = vperm.xlu1 %2760, %v3025_v33  }
 0x2e2   : > { %2762 = vset.pattern.permute.xlu1 %v2840_v31 }
 0x303   : > { %v919_v51 = vpop.permute.xlu0 %918 }
 0x307   : > { %v911_v52 = vpop.permute.xlu1 %910  ;;  %v933_v53 = vpop.permute.xlu0 %932 }
 0x30b   : > { %v925_v54 = vpop.permute.xlu1 %924  ;;  %v947_v55 = vpop.permute.xlu0 %946 }
 0x30f   : > { %v939_v56 = vpop.permute.xlu1 %938  ;;  %v961_v58 = vpop.permute.xlu0 %960 }
 0x313   : > { %v953_v59 = vpop.permute.xlu1 %952  ;;  %v975_v62 = vpop.permute.xlu0 %974 }
 0x317   : > { %v967_v63 = vpop.permute.xlu1 %966  ;;  %v989_v0 = vpop.permute.xlu0 %988 }
 0x31b   : > { %v981_v1 = vpop.permute.xlu1 %980  ;;  %v909_v2 = vpop.permute.xlu0 %908 }
 0x31c   : > { %v914_v5 = vsel %vm573_vm2, %v909_v2, %v911_v52 }
 0x31d   : > { %1077 = vmatpush1.bf16.msra.mxu1 %v914_v5 }
 0x31e   : > { %1078 = vmatprep.subr.bf16.mxu1 %v2840_v31 }
 0x31f   : > { %v905_v32 = vpop.permute.xlu1 %904  ;;  %v921_v33 = vpop.permute.xlu0 %920 }
 0x320   : > { %v926_v16 = vsel %vm589_vm3, %v919_v51, %v921_v33 }
 0x323   : > { %v907_v6 = vpop.permute.xlu1 %906  ;;  %v935_v7 = vpop.permute.xlu0 %934 }
 0x324   : > { %v912_v8 = vsel %vm573_vm2, %v905_v32, %v907_v6  ;;  %v913_v9 = vsel %vm573_vm2, %v907_v6, %v909_v2  ;;  %v940_v21 = vsel %vm605_vm6, %v933_v53, %v935_v7 }
 0x325   : > { %1033 = vmatprep.subr.bf16.mxu0 %v913_v9 }
 0x326   : > { %1034 = vmatpush1.bf16.msra.mxu0 %v912_v8 }
 0x327   : > { %v923_v11 = vpop.permute.xlu1 %922  ;;  %v949_v12 = vpop.permute.xlu0 %948 }
 0x328   : > { %v928_v13 = vsel %vm589_vm3, %v923_v11, %v925_v54  ;;  %v927_v14 = vsel %vm589_vm3, %v921_v33, %v923_v11  ;;  %v954_v28 = vsel %vm617_vm10, %v947_v55, %v949_v12  ;;  %v2845_v55 = vmov 0.0|0.0  }
 0x329   : > { %1035 = vmatprep.subr.bf16.mxu0 %v927_v14  ;;  %1079 = vmatpush1.bf16.msra.mxu1 %v928_v13 }
 0x32a   : > { %1036 = vmatpush1.bf16.msra.mxu0 %v926_v16  ;;  %1080 = vmatprep.subr.bf16.mxu1 %v2840_v31 }
 0x32b   : > { %v937_v17 = vpop.permute.xlu1 %936  ;;  %v963_v18 = vpop.permute.xlu0 %962 }
 0x32c   : > { %v942_v19 = vsel %vm605_vm6, %v937_v17, %v939_v56  ;;  %v941_v20 = vsel %vm605_vm6, %v935_v7, %v937_v17  ;;  %v968_v37 = vsel %vm629_vm8, %v961_v58, %v963_v18  ;;  %v1191_v56 = vld [vmem:[%s3548_s7] sm:$0xf] }
 0x32d   : > { %1037 = vmatprep.subr.bf16.mxu0 %v941_v20  ;;  %1081 = vmatpush1.bf16.msra.mxu1 %v942_v19 }
 0x32e   : > { %1038 = vmatpush1.bf16.msra.mxu0 %v940_v21  ;;  %1082 = vmatprep.subr.bf16.mxu1 %v2840_v31 }
 0x32f   : > { %v951_v22 = vpop.permute.xlu1 %950  ;;  %v977_v24 = vpop.permute.xlu0 %976  ;;  %1194 = vperm.xlu0 %2761, %v1191_v56  }
 0x330   : > { %v956_v25 = vsel %vm617_vm10, %v951_v22, %v953_v59  ;;  %v955_v27 = vsel %vm617_vm10, %v949_v12, %v951_v22  ;;  %v982_v42 = vsel %vm641_vm9, %v975_v62, %v977_v24 }
 0x331   : > { %1039 = vmatprep.subr.bf16.mxu0 %v955_v27  ;;  %1083 = vmatpush1.bf16.msra.mxu1 %v956_v25 }
 0x332   : > { %1040 = vmatpush1.bf16.msra.mxu0 %v954_v28  ;;  %1084 = vmatprep.subr.bf16.mxu1 %v2840_v31 }
 0x333   : > { %v965_v29 = vpop.permute.xlu1 %964  ;;  %v991_v30 = vpop.permute.xlu0 %990 }
 0x334   : > { %v970_v34 = vsel %vm629_vm8, %v965_v29, %v967_v63  ;;  %v969_v35 = vsel %vm629_vm8, %v963_v18, %v965_v29  ;;  %v996_v47 = vsel %vm653_vm11, %v989_v0, %v991_v30 }
 0x335   : > { %1041 = vmatprep.subr.bf16.mxu0 %v969_v35  ;;  %1085 = vmatpush1.bf16.msra.mxu1 %v970_v34 }
 0x336   : > { %1042 = vmatpush1.bf16.msra.mxu0 %v968_v37  ;;  %1086 = vmatprep.subr.bf16.mxu1 %v2840_v31 }
 0x337   : > { %v979_v38 = vpop.permute.xlu1 %978  ;;  %v1005_v40 = vpop.permute.xlu0 %1004 }
 0x338   : > { %v984_v39 = vsel %vm641_vm9, %v979_v38, %v981_v1  ;;  %v983_v41 = vsel %vm641_vm9, %v977_v24, %v979_v38  ;;  %v1160_v38 = vsel %vm1159_vm7, 1, %v2840_v31 }
 0x339   : > { %1043 = vmatprep.subr.bf16.mxu0 %v983_v41  ;;  %1087 = vmatpush1.bf16.msra.mxu1 %v984_v39  ;;  %v1168_v41 = vrot.slane %v1160_v38, %v3095_v60 }
 0x33a   : > { %1044 = vmatpush1.bf16.msra.mxu0 %v982_v42  ;;  %1088 = vmatprep.subr.bf16.mxu1 %v2840_v31 }
 0x33b   : > { %v993_v43 = vpop.permute.xlu1 %992  ;;  %v1003_v48 = vpop.permute.xlu0 %1002 }
 0x33c   : > { %v997_v46 = vsel %vm653_vm11, %v991_v30, %v993_v43  ;;  %v1010_v36 = vsel %vm3558_vm12, %v1003_v48, %v1005_v40  ;;  %v1190_v30 = vld [vmem:[%s3547_s6] sm:$0xf]  ;;  %v1692_v48 = vld [vmem:[%s3552_s11 + $0x8] sm:$0xff] }
 0x33d   : > { %1045 = vmatprep.subr.bf16.mxu0 %v997_v46 }
 0x33e   : > { %1046 = vmatpush1.bf16.msra.mxu0 %v996_v47 }
 0x33f   : > { %v1007_v49 = vpop.permute.xlu1 %1006  ;;  %v1009_v53 = vpop.permute.xlu0 %1008 }
 0x340   : > { %v1011_v50 = vsel %vm3558_vm12, %v1005_v40, %v1007_v49  ;;  %v1012_v54 = vsel %vm3558_vm12, %v1007_v49, %v1009_v53  ;;  %v1164_v40 = vrot.slane %v1160_v38, %v3092_v57  ;;  %vm3263_vm12 = vcmp.eq.s32.totalorder %v1168_v41, 1  ;;  %v2613_v41 = vld [vmem:[%s3552_s11 + $0x30] sm:$0xff] }
 0x341   : > { %1047 = vmatprep.subr.bf16.mxu0 %v1011_v50  ;;  %v1172_v50 = vrot.slane %v1160_v38, %v3103_v4  ;;  %v1691_v38 = vld [vmem:[%s3552_s11] sm:$0xff] }
 0x342   : > { %1048 = vmatpush1.bf16.msra.mxu0 %v1010_v36  ;;  %vm3257_vm13 = vcmp.eq.s32.totalorder %v1164_v40, 1  ;;  %v2605_v40 = vld [vmem:[%s3552_s11 + $0x20] sm:$0xff] }
 0x343   : > { %v995_v51 = vpop.permute.xlu1 %994  ;;  %vm3276_vm7 = vcmp.eq.s32.totalorder %v1172_v50, 1  ;;  %v2606_v50 = vld [vmem:[%s3552_s11 + $0x28] sm:$0xff] }
 0x344   : > { %v998_v52 = vsel %vm653_vm11, %v993_v43, %v995_v51 }
 0x345   : > { %1064 = vmatmul.mubr.bf16.vlgmr.msra.gmra.mrb[4].mxu0 %v2771_v45  ;;  %1089 = vmatpush1.bf16.msra.mxu1 %v998_v52 }
 0x346   : > { %1090 = vmatprep.subr.bf16.mxu1 %v2840_v31  ;;  %1264 = vmatprep.mubr.f32.mxu0 %v2837_v26 }
 0x349   : > { %1091 = vmatpush1.bf16.msra.mxu1 %v1012_v54 }
 0x34a   : > { %2719 = vmatprep.subr.bf16.mxu1 %v2845_v55 }
 0x34c   : > { %1107 = vmatmul.mubr.bf16.vlgmr.msra.gmra.mrb[4].mxu1 %v2771_v45 }
 0x34d   : > { %2672 = vmatprep.mubr.msk.f32.mxu1 %vm2841_vm1, %v2837_v26 }
 0x350   : > { %v1121_v63 = vpop.permute.xlu0 %1120 }
 0x354   : > { %v1117_v58 = vpop.permute.xlu1 %1116 }
 0x359   : > { %v1131_v59 = vpop.permute.xlu1 %1130 }
 0x35d   : > { %v1135_v32 = vpop.permute.xlu1 %1134 }
 0x3ae   : > { %v1195_v39 = vpop.permute.xlu0 %1194 }
 0x418   : > { %v1065_v62 = vpop.f32.mrb[4].mxu0 }
 0x419   : > { %v1123_v0 = vmul.f32 %v1117_v58, %v1065_v62  ;;  %v1067_v1 = vpop.f32.mrb[5].mxu0 }
 0x41a   : > { %v1124_v2 = vmul.f32 %v1117_v58, %v1067_v1  ;;  %v1069_v5 = vpop.f32.mrb[6].mxu0 }
 0x41b   : > { %v1126_v33 = vmul.f32 %v1121_v63, %v1069_v5  ;;  %v1071_v6 = vpop.f32.mrb[7].mxu0  ;;  %v1137_v9 = vadd.f32 %v1131_v59, %v1123_v0 }
 0x41c   : > { %v1138_v7 = vadd.f32 %v1131_v59, %v1124_v2  ;;  %v1127_v8 = vmul.f32 %v1121_v63, %v1071_v6 }
 0x41d   : > { %v1140_v11 = vadd.f32 %v1135_v32, %v1126_v33  ;;  %v3231_v20 = vmul.f32 %v1137_v9, %v3107_v10 }
 0x41e   : > { %v1141_v12 = vadd.f32 %v1135_v32, %v1127_v8  ;;  %v3225_v16 = vmul.f32 %v1138_v7, %v3111_v15 }
 0x41f   : > { %v3222_v13 = vmul.f32 %v1140_v11, %v3107_v10  ;;  %v1108_v14 = vpop.f32.mrb[4].mxu1 }
 0x420   : > { %v3228_v17 = vmul.f32 %v1141_v12, %v3111_v15  ;;  %v1125_v18 = vmul.f32 %v1117_v58, %v1108_v14  ;;  %v1110_v19 = vpop.f32.mrb[5].mxu1  ;;  %v1149_v11 = vadd.f32 %v3225_v16, %v3231_v20 }
 0x421   : > { %v1111_v21 = vpop.f32.mrb[6].mxu1  ;;  %v2717_v28 = vpack.c.bf16 %v3222_v13, %v3231_v20  ;;  %v1179_v12 = vsel %vm3257_vm13, %v3222_v13, -1e+30  ;;  %v1176_v19 = vsel %vm3257_vm13, %v3231_v20, -1e+30 }
 0x422   : > { %v1139_v22 = vadd.f32 %v1131_v59, %v1125_v18  ;;  %v1128_v24 = vmul.f32 %v1121_v63, %v1111_v21  ;;  %v1113_v25 = vpop.f32.mrb[7].mxu1  ;;  %v2715_v27 = vpack.c.bf16 %v3228_v17, %v3225_v16  ;;  %v1153_v8 = vadd.f32 %v3228_v17, %v3222_v13 }
 0x424   : > { %v1142_v29 = vadd.f32 %v1135_v32, %v1128_v24  ;;  %2716 = vmatprep.subr.bf16.mxu0 %v2715_v27  ;;  %v3241_v34 = vmul.f32 %v1139_v22, %v3115_v23  ;;  %v1180_v24 = vsel %vm3263_vm12, %v3228_v17, -1e+30  ;;  %v1177_v27 = vsel %vm3263_vm12, %v3225_v16, -1e+30 }
 0x425   : > { %2718 = vmatpush1.bf16.msra.mxu0 %v2717_v28 }
 0x426   : > { %v3244_v35 = vmul.f32 %v1142_v29, %v3115_v23  ;;  %v1178_v9 = vsel %vm3276_vm7, %v3241_v34, -1e+30  ;;  %v1150_v21 = vadd.f32 %v1149_v11, %v3241_v34  ;;  %v1369_v29 = vld [vmem:[%s3550_s9] sm:$0xff] }
 0x427   : > { %v1182_v22 = vmax.f32 %v1176_v19, %v1178_v9  ;;  %v1580_v11 = vld [vmem:[%s3555_s14] sm:$0xf] }
 0x428   : > { %2581 = vmatmul.mubr.msk.f32.vlgmr.msra.gmra.mrb[8].mxu0 %vm1027_vm15, %v1190_v30  ;;  %v2720_v37 = vpack.c.bf16 %v3244_v35, %v3241_v34  ;;  %v1181_v7 = vsel %vm3276_vm7, %v3244_v35, -1e+30  ;;  %v1154_v14 = vadd.f32 %v1153_v8, %v3244_v35 }
 0x429   : > { %v1186_v18 = vmax.f32 %v1179_v12, %v1181_v7  ;;  %v1183_v28 = vmax.f32 %v1182_v22, %v1177_v27  ;;  %v2595_v12 = vld [vmem:[%s3551_s10 + $0x10] sm:$0xff] }
 0x42a   : > { %2721 = vmatpush3.bf16.msra.mxu1 %v2720_v37  ;;  %v1372_v37 = vld [vmem:[%s3550_s9 + $0x18] sm:$0xff] }
 0x42b   : > { %2685 = vmatprep.subr.mxu1 %v2837_v26  ;;  %v1187_v25 = vmax.f32 %v1186_v18, %v1180_v24 }
 0x42d   : > { %2673 = vmatmul.mubr.msk.f32.vlgmr.msra.gmra.mrb[8].mxu1 %vm1027_vm15, %v1190_v30  ;;  %v1365_v30 = vld [vmem:[%s3549_s8] sm:$0xff] }
 0x42e   : > { %2687 = vmatprep.mubr.msk.f32.mxu1 %vm2841_vm1, %v2837_v26  ;;  %2679 = vmatprep.mubr.msk.f32.mxu0 %vm1027_vm15, %v1365_v30  ;;  %v2596_v30 = vld [vmem:[%s3551_s10 + $0x18] sm:$0xff] }
 0x4fb   : > { %v1266_v42 = vpop.f32.mrb[8].mxu0 }
 0x4fc   : > { %v1268_v43 = vpop.f32.mrb[9].mxu0  ;;  %v1267_v46 = vadd.f32 %v1266_v42, %v1195_v39  ;;  %v1496_v42 = vld [vmem:[%s3554_s13] sm:$0x3] }
 0x4fd   : > { %v1269_v47 = vadd.f32 %v1268_v43, %v1195_v39  ;;  %v1370_v43 = vld [vmem:[%s3550_s9 + $0x8] sm:$0xff] }
 0x4fe   : > { %v1341_v49 = vmul.f32 %v1267_v46, %v3107_v10  ;;  %v1352_v36 = vsel %vm3257_vm13, %v1267_v46, -1e+30  ;;  %v1371_v46 = vld [vmem:[%s3550_s9 + $0x10] sm:$0xff]  ;;  %vm1502_vm13 = vcmask 31744  }
 0x4ff   : > { %v1342_v45 = vmul.f32 %v1269_v47, %v3111_v15  ;;  %v1353_v51 = vsel %vm3263_vm12, %v1269_v47, -1e+30  ;;  %v1355_v52 = vsel %vm678_vm5, %v1352_v36, -inf  ;;  %v1581_v47 = vld [vmem:[%s3556_s15] sm:$0xf]  ;;  %vm1362_vm12 = vcmask 7168  }
 0x500   : > { %v1337_v53 = vpop.f32.mrb[8].mxu1  ;;  %v1356_v54 = vsel %vm678_vm5, %v1353_v51, -inf  ;;  %v1344_v55 = vsel %vm678_vm5, %v1341_v49, 0.0  ;;  %v2598_v49 = vld [vmem:[%s3552_s11 + $0x18] sm:$0xff] }
 0x501   : > { %v1338_v56 = vadd.f32 %v1337_v53, %v1195_v39  ;;  %v2674_v58 = vpop.f32.mrb[9].mxu1  ;;  %v1358_v59 = vmax.f32 %v1355_v52, %v1356_v54  ;;  %v1345_v62 = vsel %vm678_vm5, %v1342_v45, 0.0  ;;  %v2597_v39 = vld [vmem:[%s3552_s11 + $0x10] sm:$0xff]  ;;  %v1495_v52 = vld [vmem:[%s3553_s12] sm:$0x3] }
 0x502   : > { %v1346_v0 = vadd.f32 %v1345_v62, %v1344_v55 }
 0x503   : > { %v1343_v1 = vmul.f32 %v1338_v56, %v3115_v23  ;;  %v1354_v2 = vsel %vm3276_vm7, %v1338_v56, -1e+30 }
 0x504   : > { %v1357_v5 = vsel %vm678_vm5, %v1354_v2, -inf  ;;  %v1366_v2 = vld [vmem:[%s3549_s8 + $0x8] sm:$0xff] }
 0x505   : > { %v1359_v32 = vmax.f32 %v1358_v59, %v1357_v5  ;;  %v1347_v33 = vsel %vm678_vm5, %v1343_v1, 0.0  ;;  %v1367_v5 = vld [vmem:[%s3549_s8 + $0x10] sm:$0xff] }
 0x506   : > { %v1348_v6 = vadd.f32 %v1347_v33, %v1346_v0 }
 0x507   : > { %1360 = vmax.xlane.f32.xlu0 %v1359_v32  ;;  %v1689_v32 = vld [vmem:[%s3551_s10] sm:$0xff] }
 0x508   : > { %1349 = vadd.xlane.f32.xlu1 %v1348_v6 }
 0x50b   : > { %1155 = vadd.xlane.f32.xlu0 %v1154_v14 }
 0x50c   : > { %1151 = vadd.xlane.f32.xlu1 %v1150_v21 }
 0x50f   : > { %1188 = vmax.xlane.f32.xlu0 %v1187_v25 }
 0x510   : > { %1184 = vmax.xlane.f32.xlu1 %v1183_v28 }
 0x521   : > { %1499 = vperm.xlu1 %2762, %v1496_v42  }
 0x525   : > { %1375 = vperm.xlu0 %2761, %v1369_v29   ;;  %1380 = vperm.xlu1 %2762, %v1370_v43   ;;  %v2603_v43 = vld [vmem:[%s3551_s10 + $0x20] sm:$0xff] }
 0x529   : > { %1390 = vperm.xlu0 %2761, %v1372_v37   ;;  %1385 = vperm.xlu1 %2762, %v1371_v46  }
 0x52d   : > { %1695 = vperm.xlu0 %2761, %v1691_v38   ;;  %1584 = vperm.xlu1 %2762, %v1581_v47  }
 0x531   : > { %1823 = vperm.xlu0 %2761, %v2597_v39   ;;  %1700 = vperm.xlu1 %2762, %v1692_v48   ;;  %v2612_v48 = vld [vmem:[%s3551_s10 + $0x38] sm:$0xff] }
 0x535   : > { %1950 = vperm.xlu0 %2761, %v2605_v40   ;;  %1828 = vperm.xlu1 %2762, %v2598_v49   ;;  %v1690_v40 = vld [vmem:[%s3551_s10 + $0x8] sm:$0xff] }
 0x536   : > { %v2604_v49 = vld [vmem:[%s3551_s10 + $0x28] sm:$0xff] }
 0x539   : > { %2077 = vperm.xlu0 %2761, %v2613_v41   ;;  %1955 = vperm.xlu1 %2762, %v2606_v50   ;;  %v2611_v41 = vld [vmem:[%s3551_s10 + $0x30] sm:$0xff] }
 0x53d   : > { %2082 = vperm.xlu1 %2762, %v2614_v61  }
 0x594   : > { %v1361_v36 = vpop.xlane.xlu0 %1360 }
 0x595   : > { %v1350_v45 = vpop.xlane.xlu1 %1349 }
 0x596   : > { %v1351_v51 = vmul.f32 0.00390625, %v1350_v45 }
 0x598   : > { %v1494_v53 = vsel %vm1362_vm12, %v1351_v51, %v1361_v36  ;;  %v1156_v54 = vpop.xlane.xlu0 %1155 }
 0x599   : > { %2686 = vmatpush3.msk.msra.mxu1 %vm678_vm5, %v1494_v53  ;;  %v1152_v55 = vpop.xlane.xlu1 %1151  ;;  %v1158_v56 = vmul.f32 0.00390625, %v1156_v54  ;;  %vm1587_vm5 = vcmask 15360  }
 0x59a   : > { %2688 = vmatmul.mubr.msk.f32.vlgmr.msra.gmra.mrb[10].mxu1 %vm1502_vm13, %v1495_v52  ;;  %2690 = vmatprep.subr.mxu1 %v2837_v26  ;;  %v1157_v58 = vmul.f32 0.00390625, %v1152_v55 }
 0x59b   : > { %2692 = vmatprep.mubr.msk.f32.mxu1 %vm2841_vm1, %v2837_v26  ;;  %v1368_v26 = vld [vmem:[%s3549_s8 + $0x18] sm:$0xff]  ;;  %vm1703_vm1 = vcmask 64512  }
 0x59c   : > { %v1189_v59 = vpop.xlane.xlu0 %1188 }
 0x59d   : > { %v1364_v62 = vsel %vm1362_vm12, %v1158_v56, %v1189_v59  ;;  %v1185_v63 = vpop.xlane.xlu1 %1184 }
 0x59e   : > { %v1363_v0 = vsel %vm1362_vm12, %v1157_v58, %v1185_v63 }
 0x59f   : > { %v2722_v1 = vpack.c.bf16 %v1364_v62, %v1363_v0 }
 0x5a1   : > { %2723 = vmatprep.subr.bf16.mxu0 %v2722_v1  ;;  %v1500_v33 = vpop.permute.xlu1 %1499 }
 0x5a2   : > { %2725 = vmatpush3.bf16.msra.mxu0 %v2722_v1 }
 0x5a4   : > { %v1376_v14 = vpop.permute.xlu0 %1375 }
 0x5a5   : > { %2680 = vmatmul.mubr.msk.f32.vlgmr.msra.gmra.mrb[10].mxu0 %vm1027_vm15, %v1366_v2  ;;  %v1381_v18 = vpop.permute.xlu1 %1380 }
 0x5a6   : > { %2682 = vmatprep.mubr.msk.f32.mxu0 %vm1027_vm15, %v1367_v5 }
 0x5a8   : > { %v1391_v27 = vpop.permute.xlu0 %1390 }
 0x5a9   : > { %2683 = vmatmul.mubr.msk.f32.gmra.mrb[12].mxu0 %vm1027_vm15, %v1368_v26  ;;  %v1386_v37 = vpop.permute.xlu1 %1385 }
 0x5aa   : > { %2697 = vmatprep.mubr.msk.f32.mxu0 %vm1703_vm1, %v1689_v32 }
 0x5ac   : > { %v1696_v51 = vpop.permute.xlu0 %1695 }
 0x5ad   : > { %v1585_v50 = vpop.permute.xlu1 %1584 }
 0x5b0   : > { %v1824_v56 = vpop.permute.xlu0 %1823 }
 0x5b1   : > { %v1701_v54 = vpop.permute.xlu1 %1700 }
 0x5b4   : > { %v1951_v26 = vpop.permute.xlu0 %1950 }
 0x5b5   : > { %v1829_v62 = vpop.permute.xlu1 %1828 }
 0x66d   : > { %v1575_v6 = vpop.f32.mrb[10].mxu1 }
 0x66e   : > { %v1576_v7 = vadd.f32 %v1575_v6, %v1500_v33  ;;  %v2689_v8 = vpop.f32.mrb[11].mxu1 }
 0x670   : > { %v1579_v9 = vmax.f32 %v1576_v7, 0.0 }
 0x672   : > { %2691 = vmatpush3.msk.msra.mxu1 %vm669_vm4, %v1579_v9  ;;  %vm1664_vm4 = vcmask 11264  }
 0x673   : > { %2693 = vmatmul.mubr.msk.f32.vlgmr.msra.gmra.mrb[12].mxu1 %vm1587_vm5, %v1580_v11 }
 0x674   : > { %2702 = vmatprep.mubr.msk.f32.mxu1 %vm1703_vm1, %v2595_v12 }
 0x678   : > { %v2681_v19 = vpop.f32.mrb[10].mxu0 }
 0x679   : > { %v1477_v21 = vadd.f32 %v2681_v19, %v1381_v18  ;;  %v1471_v22 = vpop.f32.mrb[11].mxu0 }
 0x67a   : > { %v1472_v24 = vadd.f32 %v1471_v22, %v1376_v14 }
 0x67b   : > { %v1491_v25 = vmax.f32 %v1477_v21, 0.0 }
 0x67c   : > { %v1490_v28 = vmax.f32 %v1472_v24, 0.0  ;;  %v2684_v29 = vpop.f32.mrb[12].mxu0 }
 0x67d   : > { %v1487_v38 = vadd.f32 %v2684_v29, %v1391_v27  ;;  %v1481_v39 = vpop.f32.mrb[13].mxu0  ;;  %2700 = vmatprep.subr.mxu1 %v1491_v25  ;;  %v2078_v27 = vpop.permute.xlu0 %2077 }
 0x67e   : > { %v1482_v42 = vadd.f32 %v1481_v39, %v1386_v37  ;;  %2695 = vmatprep.subr.mxu0 %v1490_v28  ;;  %2701 = vmatpush3.msra.mxu1 %v1491_v25  ;;  %v1956_v37 = vpop.permute.xlu1 %1955 }
 0x67f   : > { %v1493_v46 = vmax.f32 %v1487_v38, 0.0  ;;  %2696 = vmatpush3.msra.mxu0 %v1490_v28  ;;  %2703 = vmatmul.mubr.msk.f32.vlgmr.msra.gmra.mrb[14].mxu1 %vm1703_vm1, %v2596_v30 }
 0x680   : > { %v1492_v47 = vmax.f32 %v1482_v42, 0.0  ;;  %2698 = vmatmul.mubr.msk.f32.vlgmr.msra.gmra.mrb[14].mxu0 %vm1703_vm1, %v1690_v40  ;;  %2712 = vmatprep.mubr.msk.f32.mxu1 %vm1703_vm1, %v2611_v41 }
 0x681   : > { %2710 = vmatprep.subr.mxu1 %v1493_v46  ;;  %2707 = vmatprep.mubr.msk.f32.mxu0 %vm1703_vm1, %v2603_v43 }
 0x682   : > { %2705 = vmatprep.subr.mxu0 %v1492_v47  ;;  %2711 = vmatpush3.msra.mxu1 %v1493_v46  ;;  %v2083_v42 = vpop.permute.xlu1 %2082 }
 0x683   : > { %2706 = vmatpush3.msra.mxu0 %v1492_v47  ;;  %2713 = vmatmul.mubr.msk.f32.vlgmr.msra.gmra.mrb[16].mxu1 %vm1703_vm1, %v2612_v48 }
 0x684   : > { %2708 = vmatmul.mubr.msk.f32.vlgmr.msra.gmra.mrb[16].mxu0 %vm1703_vm1, %v2604_v49  ;;  %2422 = vmatprep.subr.bf16.mxu1 %v2840_v31 }
 0x685   : > { %2625 = vmatprep.mubr.msk.bf16.mxu0 %vm1027_vm15, %v2772_v44  ;;  %2626 = vmatprep.mubr.msk.bf16.mxu1 %vm1027_vm15, %v2772_v44 }
 0x746   : > { %v1660_v61 = vpop.f32.mrb[12].mxu1 }
 0x747   : > { %v1661_v36 = vadd.f32 %v1660_v61, %v1585_v50  ;;  %v2694_v45 = vpop.f32.mrb[13].mxu1 }
 0x749   : > { %v1665_v52 = vsel %vm1664_vm4, %v1661_v36, -inf }
 0x74a   : > { %v1666_v53 = vrot.slane %v1665_v52, 4 }
 0x74c   : > { %v1667_v55 = vmax.f32 %v1665_v52, %v1666_v53 }
 0x74e   : > { %v1668_v58 = vrot.slane %v1667_v55, 2 }
 0x750   : > { %v1669_v59 = vmax.f32 %v1667_v55, %v1668_v58 }
 0x752   : > { %v1670_v63 = vrot.slane %v1669_v59, 1  ;;  %v2704_v0 = vpop.f32.mrb[14].mxu1 }
 0x753   : > { %v1909_v1 = vadd.f32 %v2704_v0, %v1829_v62  ;;  %v2699_v2 = vpop.f32.mrb[14].mxu0  ;;  %v1903_v5 = vpop.f32.mrb[15].mxu1 }
 0x754   : > { %v1671_v32 = vmax.f32 %v1669_v59, %v1670_v63  ;;  %v1782_v33 = vadd.f32 %v2699_v2, %v1701_v54  ;;  %v1776_v6 = vpop.f32.mrb[15].mxu0  ;;  %v1904_v12 = vadd.f32 %v1903_v5, %v1824_v56 }
 0x755   : > { %v2602_v7 = vmul.f32 -1.442695, %v1909_v1  ;;  %v1777_v8 = vadd.f32 %v1776_v6, %v1696_v51 }
 0x756   : > { %v1672_v9 = vsub.f32 %v1661_v36, %v1671_v32  ;;  %v2594_v11 = vmul.f32 -1.442695, %v1782_v33  ;;  %v2714_v14 = vpop.f32.mrb[16].mxu1  ;;  %v2601_v28 = vmul.f32 -1.442695, %v1904_v12 }
 0x757   : > { %2775 = vpow2.f32 %v2602_v7  ;;  %v2593_v18 = vmul.f32 -1.442695, %v1777_v8  ;;  %v2709_v19 = vpop.f32.mrb[16].mxu0  ;;  %v2157_v21 = vpop.f32.mrb[17].mxu1  ;;  %v2163_v46 = vadd.f32 %v2714_v14, %v2083_v42 }
 0x758   : > { %v1673_v22 = vmul.f32 1.442695, %v1672_v9  ;;  %2777 = vpow2.f32 %v2594_v11  ;;  %v2030_v24 = vpop.f32.mrb[17].mxu0  ;;  %v2158_v29 = vadd.f32 %v2157_v21, %v2078_v27  ;;  %v2036_v38 = vadd.f32 %v2709_v19, %v1956_v37 }
 0x759   : > { %v2031_v25 = vadd.f32 %v2030_v24, %v1951_v26  ;;  %v2618_v51 = vmul.f32 -1.442695, %v2163_v46 }
 0x75a   : > { %2779 = vpow2.f32 %v1673_v22  ;;  %v2617_v39 = vmul.f32 -1.442695, %v2158_v29  ;;  %v2610_v47 = vmul.f32 -1.442695, %v2036_v38  ;;  %v2190_v29 = vsub.s32 3, %v2943_v3 }
 0x75b   : > { %2781 = vpow2.f32 %v2593_v18  ;;  %v2609_v30 = vmul.f32 -1.442695, %v2031_v25 }
 0x75c   : > { %2783 = vpow2.f32 %v2601_v28 }
 0x75d   : > { %2785 = vpow2.f32 %v2609_v30 }
 0x75e   : > { %2787 = vpow2.f32 %v2617_v39 }
 0x761   : > { %v2776_v40 = vpop.eup %2775 }
 0x762   : > { %v2778_v41 = vpop.eup %2777  ;;  %v1919_v61 = vadd.f32 1.0, %v2776_v40 }
 0x763   : > { %v1792_v43 = vadd.f32 1.0, %v2778_v41 }
 0x764   : > { %v2780_v48 = vpop.eup %2779 }
 0x765   : > { %v2782_v49 = vpop.eup %2781  ;;  %v1675_v50 = vsel %vm1664_vm4, %v2780_v48, 0.0  ;;  %2789 = vrcp.f32 %v1792_v43 }
 0x766   : > { %v1676_v36 = vrot.slane %v1675_v50, 4  ;;  %v1791_v45 = vadd.f32 1.0, %v2782_v49  ;;  %2791 = vpow2.f32 %v2610_v47  ;;  %v2784_v52 = vpop.eup %2783 }
 0x767   : > { %v2786_v54 = vpop.eup %2785  ;;  %v1918_v59 = vadd.f32 1.0, %v2784_v52 }
 0x768   : > { %v1677_v53 = vadd.f32 %v1676_v36, %v1675_v50  ;;  %2793 = vrcp.f32 %v1791_v45  ;;  %v2045_v56 = vadd.f32 1.0, %v2786_v54  ;;  %v2788_v62 = vpop.eup %2787 }
 0x769   : > { %2795 = vrcp.f32 %v1919_v61  ;;  %v2172_v2 = vadd.f32 1.0, %v2788_v62 }
 0x76a   : > { %v1678_v55 = vrot.slane %v1677_v53, 2  ;;  %2797 = vpow2.f32 %v2618_v51 }
 0x76b   : > { %2799 = vrcp.f32 %v2045_v56 }
 0x76c   : > { %v1679_v58 = vadd.f32 %v1678_v55, %v1677_v53  ;;  %2801 = vrcp.f32 %v1918_v59 }
 0x76e   : > { %v1680_v63 = vrot.slane %v1679_v58, 1 }
 0x76f   : > { %v2790_v0 = vpop.eup %2789 }
 0x770   : > { %v1681_v1 = vadd.f32 %v1680_v63, %v1679_v58  ;;  %1801 = vrot.lane.b32.xlu0 %v2790_v0, %s2832_s30  ;;  %v2792_v5 = vpop.eup %2791 }
 0x771   : > { %v2046_v33 = vadd.f32 1.0, %v2792_v5 }
 0x772   : > { %v2794_v26 = vpop.eup %2793  ;;  %2803 = vrcp.f32 %v1681_v1 }
 0x773   : > { %v2796_v32 = vpop.eup %2795  ;;  %1799 = vrot.lane.b32.xlu1 %v2794_v26, %s2832_s30  ;;  %2805 = vrcp.f32 %v2172_v2 }
 0x774   : > { %1928 = vrot.lane.b32.xlu0 %v2796_v32, %s2832_s30  ;;  %v2798_v6 = vpop.eup %2797  ;;  %2807 = vrcp.f32 %v2046_v33 }
 0x775   : > { %v2800_v7 = vpop.eup %2799  ;;  %v2173_v8 = vadd.f32 1.0, %v2798_v6 }
 0x776   : > { %v2802_v9 = vpop.eup %2801 }
 0x777   : > { %2053 = vrot.lane.b32.xlu1 %v2800_v7, %s2832_s30  ;;  %2809 = vrcp.f32 %v2173_v8 }
 0x77b   : > { %1926 = vrot.lane.b32.xlu1 %v2802_v9, %s2832_s30 }
 0x77c   : > { %v2804_v11 = vpop.eup %2803 }
 0x77d   : > { %v1683_v12 = vmul.f32 %v2804_v11, %v2780_v48  ;;  %v2806_v14 = vpop.eup %2805 }
 0x77e   : > { %v2808_v18 = vpop.eup %2807 }
 0x77f   : > { %2180 = vrot.lane.b32.xlu1 %v2806_v14, %s2832_s30  ;;  %1685 = vrot.lane.b32.xlu0 %v1683_v12, %s2832_s30 }
 0x781   : > { %v2810_v19 = vpop.eup %2809 }
 0x783   : > { %2055 = vrot.lane.b32.xlu0 %v2808_v18, %s2832_s30 }
 0x787   : > { %2182 = vrot.lane.b32.xlu0 %v2810_v19, %s2832_s30 }
 0x7e2   : > { %v1802_v22 = vpop.permute.xlu0 %1801 }
 0x7e3   : > { %v1806_v37 = vadd.f32 %v2790_v0, %v1802_v22 }
 0x7e5   : > { %v1800_v21 = vpop.permute.xlu1 %1799 }
 0x7e6   : > { %v1929_v25 = vpop.permute.xlu0 %1928  ;;  %v1805_v38 = vadd.f32 %v2794_v26, %v1800_v21 }
 0x7e7   : > { %v1933_v39 = vadd.f32 %v2796_v32, %v1929_v25 }
 0x7e9   : > { %v2054_v24 = vpop.permute.xlu1 %2053 }
 0x7ea   : > { %v2059_v46 = vadd.f32 %v2800_v7, %v2054_v24 }
 0x7ed   : > { %v1927_v27 = vpop.permute.xlu1 %1926 }
 0x7ee   : > { %v1932_v40 = vadd.f32 %v2802_v9, %v1927_v27 }
 0x7f1   : > { %v1686_v28 = vpop.permute.xlu0 %1685  ;;  %v2181_v47 = vpop.permute.xlu1 %2180 }
 0x7f2   : > { %v1688_v30 = vadd.f32 %v1686_v28, %v1683_v12  ;;  %v2186_v51 = vadd.f32 %v2806_v14, %v2181_v47 }
 0x7f4   : > { %v1810_v41 = vrot.slane %v1688_v30, %v3092_v57  ;;  %v1937_v42 = vrot.slane %v1688_v30, %v3095_v60  ;;  %v2064_v43 = vrot.slane %v1688_v30, %v3103_v4  ;;  %v2191_v49 = vrot.slane %v1688_v30, %v2190_v29 }
 0x7f5   : > { %v2056_v48 = vpop.permute.xlu0 %2055 }
 0x7f6   : > { %v1811_v50 = vmul.f32 %v1810_v41, %v1805_v38  ;;  %v1938_v61 = vmul.f32 %v1937_v42, %v1932_v40  ;;  %v1812_v36 = vmul.f32 %v1810_v41, %v1806_v37  ;;  %v1939_v45 = vmul.f32 %v1937_v42, %v1933_v39  ;;  %v2819_v40 = vld [vmem:[%s3546_s5] sm:$0xff]  ;;  %v2820_v41 = vld [vmem:[%s3546_s5 + $0x8] sm:$0xff] }
 0x7f7   : > { %v2060_v3 = vadd.f32 %v2808_v18, %v2056_v48  ;;  %v2065_v54 = vmul.f32 %v2064_v43, %v2059_v46  ;;  %v2192_v60 = vmul.f32 %v2191_v49, %v2186_v51  ;;  %v2846_v39 = vmov 4  }
 0x7f8   : > { %v1941_v52 = vadd.f32 %v1939_v45, %v1812_v36  ;;  %v1940_v53 = vadd.f32 %v1938_v61, %v1811_v50  ;;  %v2847_v42 = vmov 5  }
 0x7f9   : > { %v2066_v55 = vmul.f32 %v2064_v43, %v2060_v3  ;;  %v2183_v56 = vpop.permute.xlu0 %2182 }
 0x7fa   : > { %v2067_v57 = vadd.f32 %v2065_v54, %v1940_v53  ;;  %v2187_v58 = vadd.f32 %v2810_v19, %v2183_v56 }
 0x7fb   : > { %v2068_v59 = vadd.f32 %v2066_v55, %v1941_v52 }
 0x7fc   : > { %v2193_v4 = vmul.f32 %v2191_v49, %v2187_v58  ;;  %v2194_v62 = vadd.f32 %v2192_v60, %v2067_v57 }
 0x7fe   : > { %v2195_v63 = vadd.f32 %v2193_v4, %v2068_v59  ;;  %v2619_v0 = vmul.f32 -1.442695, %v2194_v62 }
 0x800   : > { %2811 = vpow2.f32 %v2619_v0  ;;  %v2620_v1 = vmul.f32 -1.442695, %v2195_v63 }
 0x802   : > { %2813 = vpow2.f32 %v2620_v1 }
 0x80a   : > { %v2812_v2 = vpop.eup %2811 }
 0x80b   : > { %v2202_v5 = vadd.f32 1.0, %v2812_v2 }
 0x80c   : > { %v2814_v26 = vpop.eup %2813 }
 0x80d   : > { %v2203_v32 = vadd.f32 1.0, %v2814_v26  ;;  %2815 = vrcp.f32 %v2202_v5 }
 0x80f   : > { %2817 = vrcp.f32 %v2203_v32 }
 0x817   : > { %v2816_v33 = vpop.eup %2815 }
 0x818   : > { %2210 = vperm.xlu1 %2762, %v2816_v33  }
 0x819   : > { %v2818_v6 = vpop.eup %2817 }
 0x81a   : > { %2215 = vperm.xlu0 %2761, %v2818_v6  }
 0x81c   : > { %2764 = vset.pattern.permute.xlu1 %v2846_v39 }
 0x81e   : > { %2763 = vset.pattern.permute.xlu0 %v2846_v39 }
 0x897   : > { %v2211_v7 = vpop.permute.xlu1 %2210 }
 0x898   : > { %v2218_v8 = vmul.f32 %v2211_v7, %v3231_v20  ;;  %v2219_v9 = vmul.f32 %v2211_v7, %v3225_v16  ;;  %v2220_v19 = vmul.f32 %v2211_v7, %v3241_v34 }
 0x899   : > { %v2216_v11 = vpop.permute.xlu0 %2215 }
 0x89a   : > { %v2221_v12 = vmul.f32 %v2216_v11, %v3222_v13  ;;  %v2222_v14 = vmul.f32 %v2216_v11, %v3228_v17  ;;  %v2223_v18 = vmul.f32 %v2216_v11, %v3244_v35  ;;  %v2224_v21 = vadd.f32 %v2218_v8, %v3231_v20 }
 0x89b   : > { %v2225_v24 = vadd.f32 %v2219_v9, %v3225_v16  ;;  %v2226_v30 = vadd.f32 %v2220_v19, %v3241_v34 }
 0x89c   : > { %v2227_v22 = vadd.f32 %v2221_v12, %v3222_v13  ;;  %v2228_v25 = vadd.f32 %v2222_v14, %v3228_v17  ;;  %v2229_v27 = vadd.f32 %v2223_v18, %v3244_v35 }
 0x89e   : > { %v2230_v28 = vpack.c.bf16 %v2227_v22, %v2224_v21  ;;  %v2231_v29 = vpack.c.bf16 %v2228_v25, %v2225_v24  ;;  %v2232_v37 = vpack.c.bf16 %v2229_v27, %v2226_v30 }
 0x8a0   : > { %2236 = vrot.lane.b32.xlu1 %v2230_v28, %s2830_s28  ;;  %2238 = vrot.lane.b32.xlu0 %v2231_v29, %s2830_s28 }
 0x8a4   : > { %2240 = vrot.lane.b32.xlu1 %v2232_v37, %s2830_s28  ;;  %s3581_s28 = smov 110  }
 0x912   : > { %v2237_v20 = vpop.permute.xlu1 %2236  ;;  %v2239_v38 = vpop.permute.xlu0 %2238 }
 0x913   : > { %v2242_v13 = vsel %vm550_vm0, %v2237_v20, %v2239_v38  ;;  %v2247_v34 = vsel %vm550_vm0, 0, %v2237_v20 }
 0x914   : > { %2255 = vrot.lane.b32.xlu0 %v2242_v13, %s2832_s30  ;;  %2379 = vmatprep.subr.bf16.mxu0 %v2242_v13 }
 0x915   : > { %2624 = vmatpush1.bf16.msk.msra.mxu0 %vm3128_vm14, %v2237_v20 }
 0x916   : > { %v2241_v16 = vpop.permute.xlu1 %2240 }
 0x917   : > { %v2243_v17 = vsel %vm550_vm0, %v2239_v38, %v2241_v16  ;;  %v2250_v35 = vsel %vm550_vm0, %v2241_v16, 0  ;;  %vm3587_vm0 = vcmask 736256  }
 0x918   : > { %2257 = vrot.lane.b32.xlu1 %v2243_v17, %s2832_s30  ;;  %2423 = vmatpush1.bf16.msra.mxu1 %v2243_v17 }
 0x919   : > { %2253 = vrot.lane.b32.xlu0 %v2247_v34, %s2832_s30  ;;  %2424 = vmatprep.subr.bf16.mxu1 %v2840_v31 }
 0x91c   : > { %2259 = vrot.lane.b32.xlu1 %v2250_v35, %s2832_s30  ;;  %s3583_s30 = smov 108  }
 0x91d   : > { %2269 = vrot.lane.b32.xlu0 %v2242_v13, %s2833_s0 }
 0x920   : > { %2271 = vrot.lane.b32.xlu1 %v2243_v17, %s2833_s0 }
 0x921   : > { %2267 = vrot.lane.b32.xlu0 %v2247_v34, %s2833_s0 }
 0x924   : > { %2273 = vrot.lane.b32.xlu1 %v2250_v35, %s2833_s0  ;;  %s3584_s0 = smov 92  }
 0x925   : > { %2283 = vrot.lane.b32.xlu0 %v2242_v13, %s3581_s28 }
 0x928   : > { %2285 = vrot.lane.b32.xlu1 %v2243_v17, %s3581_s28 }
 0x929   : > { %2281 = vrot.lane.b32.xlu0 %v2247_v34, %s3581_s28 }
 0x92c   : > { %2287 = vrot.lane.b32.xlu1 %v2250_v35, %s3581_s28 }
 0x92d   : > { %2297 = vrot.lane.b32.xlu0 %v2242_v13, %s3582_s17 }
 0x930   : > { %2299 = vrot.lane.b32.xlu1 %v2243_v17, %s3582_s17 }
 0x931   : > { %2295 = vrot.lane.b32.xlu0 %v2247_v34, %s3582_s17 }
 0x934   : > { %2301 = vrot.lane.b32.xlu1 %v2250_v35, %s3582_s17  ;;  %s2727_s17 = smul.u32 48, %s3591_s22 }
 0x935   : > { %2311 = vrot.lane.b32.xlu0 %v2242_v13, %s3583_s30 }
 0x938   : > { %2313 = vrot.lane.b32.xlu1 %v2243_v17, %s3583_s30 }
 0x939   : > { %2309 = vrot.lane.b32.xlu0 %v2247_v34, %s3583_s30 }
 0x93c   : > { %2315 = vrot.lane.b32.xlu1 %v2250_v35, %s3583_s30 }
 0x93d   : > { %2325 = vrot.lane.b32.xlu0 %v2242_v13, %s3584_s0 }
 0x940   : > { %2327 = vrot.lane.b32.xlu1 %v2243_v17, %s3584_s0 }
 0x941   : > { %2323 = vrot.lane.b32.xlu0 %v2247_v34, %s3584_s0 }
 0x944   : > { %2329 = vrot.lane.b32.xlu1 %v2250_v35, %s3584_s0 }
 0x945   : > { %2339 = vrot.lane.b32.xlu0 %v2242_v13, %s3585_s19 }
 0x948   : > { %2341 = vrot.lane.b32.xlu1 %v2243_v17, %s3585_s19 }
 0x949   : > { %2337 = vrot.lane.b32.xlu0 %v2247_v34, %s3585_s19 }
 0x94c   : > { %2343 = vrot.lane.b32.xlu1 %v2250_v35, %s3585_s19  ;;  %s521_s19 = scalar_lea.vmem %s3557_s16, %s2727_s17 }
 0x94d   : > { %2353 = vrot.lane.b32.xlu0 %v2242_v13, %s3586_s25 }
 0x950   : > { %2355 = vrot.lane.b32.xlu1 %v2243_v17, %s3586_s25 }
 0x951   : > { %2351 = vrot.lane.b32.xlu0 %v2247_v34, %s3586_s25 }
 0x954   : > { %2357 = vrot.lane.b32.xlu1 %v2250_v35, %s3586_s25  ;;  %v2774_v35 = vld [vmem:[%s3545_s4] ss:$8 sps:$4 sm:$0xff]  }
 0x955   : > { %2464 = vperm.xlu0 %2763, %v2819_v40  }
 0x958   : > { %2468 = vperm.xlu1 %2764, %v2820_v41  }
 0x959   : > { %2766 = vset.pattern.permute.xlu0 %v2847_v42 }
 0x95a   : > { %2482 = vperm.xlu0 %2766, %v2820_v41  }
 0x95c   : > { %2765 = vset.pattern.permute.xlu1 %v2847_v42 }
 0x95d   : > { %2478 = vperm.xlu1 %2765, %v2819_v40  }
 0x986   : > { %v2256_v43 = vpop.permute.xlu0 %2255 }
 0x98a   : > { %v2258_v46 = vpop.permute.xlu1 %2257 }
 0x98b   : > { %v2254_v47 = vpop.permute.xlu0 %2253  ;;  %v2262_v48 = vsel %vm573_vm2, %v2256_v43, %v2258_v46 }
 0x98c   : > { %v2261_v49 = vsel %vm573_vm2, %v2254_v47, %v2256_v43  ;;  %2381 = vmatprep.subr.bf16.mxu0 %v2262_v48 }
 0x98d   : > { %2382 = vmatpush1.bf16.msra.mxu0 %v2261_v49 }
 0x98e   : > { %v2260_v50 = vpop.permute.xlu1 %2259 }
 0x98f   : > { %v2270_v61 = vpop.permute.xlu0 %2269  ;;  %v2263_v36 = vsel %vm573_vm2, %v2258_v46, %v2260_v50  ;;  %vm3588_vm2 = vmmov %vm3587_vm0 }
 0x990   : > { %2425 = vmatpush1.bf16.msra.mxu1 %v2263_v36 }
 0x991   : > { %2426 = vmatprep.subr.bf16.mxu1 %v2840_v31 }
 0x992   : > { %v2272_v45 = vpop.permute.xlu1 %2271 }
 0x993   : > { %v2268_v3 = vpop.permute.xlu0 %2267  ;;  %v2276_v51 = vsel %vm589_vm3, %v2270_v61, %v2272_v45 }
 0x994   : > { %v2275_v52 = vsel %vm589_vm3, %v2268_v3, %v2270_v61  ;;  %2383 = vmatprep.subr.bf16.mxu0 %v2276_v51 }
 0x995   : > { %2384 = vmatpush1.bf16.msra.mxu0 %v2275_v52 }
 0x996   : > { %v2274_v53 = vpop.permute.xlu1 %2273 }
 0x997   : > { %v2284_v54 = vpop.permute.xlu0 %2283  ;;  %v2277_v55 = vsel %vm589_vm3, %v2272_v45, %v2274_v53  ;;  %vm3589_vm3 = vmmov %vm3587_vm0 }
 0x998   : > { %2427 = vmatpush1.bf16.msra.mxu1 %v2277_v55 }
 0x999   : > { %2428 = vmatprep.subr.bf16.mxu1 %v2840_v31 }
 0x99a   : > { %v2286_v56 = vpop.permute.xlu1 %2285 }
 0x99b   : > { %v2282_v57 = vpop.permute.xlu0 %2281  ;;  %v2290_v58 = vsel %vm605_vm6, %v2284_v54, %v2286_v56 }
 0x99c   : > { %v2289_v60 = vsel %vm605_vm6, %v2282_v57, %v2284_v54  ;;  %2385 = vmatprep.subr.bf16.mxu0 %v2290_v58 }
 0x99d   : > { %2386 = vmatpush1.bf16.msra.mxu0 %v2289_v60 }
 0x99e   : > { %v2288_v59 = vpop.permute.xlu1 %2287 }
 0x99f   : > { %v2298_v4 = vpop.permute.xlu0 %2297  ;;  %v2291_v62 = vsel %vm605_vm6, %v2286_v56, %v2288_v59 }
 0x9a0   : > { %2429 = vmatpush1.bf16.msra.mxu1 %v2291_v62 }
 0x9a1   : > { %2430 = vmatprep.subr.bf16.mxu1 %v2840_v31 }
 0x9a2   : > { %v2300_v63 = vpop.permute.xlu1 %2299 }
 0x9a3   : > { %v2296_v0 = vpop.permute.xlu0 %2295  ;;  %v2304_v1 = vsel %vm617_vm10, %v2298_v4, %v2300_v63 }
 0x9a4   : > { %v2303_v2 = vsel %vm617_vm10, %v2296_v0, %v2298_v4  ;;  %2387 = vmatprep.subr.bf16.mxu0 %v2304_v1 }
 0x9a5   : > { %2388 = vmatpush1.bf16.msra.mxu0 %v2303_v2 }
 0x9a6   : > { %v2302_v5 = vpop.permute.xlu1 %2301 }
 0x9a7   : > { %v2312_v26 = vpop.permute.xlu0 %2311  ;;  %v2305_v32 = vsel %vm617_vm10, %v2300_v63, %v2302_v5 }
 0x9a8   : > { %2431 = vmatpush1.bf16.msra.mxu1 %v2305_v32 }
 0x9a9   : > { %2432 = vmatprep.subr.bf16.mxu1 %v2840_v31 }
 0x9aa   : > { %v2314_v33 = vpop.permute.xlu1 %2313 }
 0x9ab   : > { %v2310_v6 = vpop.permute.xlu0 %2309  ;;  %v2318_v7 = vsel %vm629_vm8, %v2312_v26, %v2314_v33 }
 0x9ac   : > { %v2317_v8 = vsel %vm629_vm8, %v2310_v6, %v2312_v26  ;;  %2389 = vmatprep.subr.bf16.mxu0 %v2318_v7 }
 0x9ad   : > { %2390 = vmatpush1.bf16.msra.mxu0 %v2317_v8 }
 0x9ae   : > { %v2316_v9 = vpop.permute.xlu1 %2315 }
 0x9af   : > { %v2326_v11 = vpop.permute.xlu0 %2325  ;;  %v2319_v12 = vsel %vm629_vm8, %v2314_v33, %v2316_v9 }
 0x9b0   : > { %2433 = vmatpush1.bf16.msra.mxu1 %v2319_v12 }
 0x9b1   : > { %2434 = vmatprep.subr.bf16.mxu1 %v2840_v31 }
 0x9b2   : > { %v2328_v14 = vpop.permute.xlu1 %2327 }
 0x9b3   : > { %v2324_v18 = vpop.permute.xlu0 %2323  ;;  %v2332_v19 = vsel %vm641_vm9, %v2326_v11, %v2328_v14 }
 0x9b4   : > { %v2331_v21 = vsel %vm641_vm9, %v2324_v18, %v2326_v11  ;;  %2391 = vmatprep.subr.bf16.mxu0 %v2332_v19 }
 0x9b5   : > { %2392 = vmatpush1.bf16.msra.mxu0 %v2331_v21 }
 0x9b6   : > { %v2330_v22 = vpop.permute.xlu1 %2329 }
 0x9b7   : > { %v2340_v24 = vpop.permute.xlu0 %2339  ;;  %v2333_v25 = vsel %vm641_vm9, %v2328_v14, %v2330_v22 }
 0x9b8   : > { %2435 = vmatpush1.bf16.msra.mxu1 %v2333_v25 }
 0x9b9   : > { %2436 = vmatprep.subr.bf16.mxu1 %v2840_v31 }
 0x9ba   : > { %v2342_v27 = vpop.permute.xlu1 %2341 }
 0x9bb   : > { %v2338_v28 = vpop.permute.xlu0 %2337  ;;  %v2346_v29 = vsel %vm653_vm11, %v2340_v24, %v2342_v27 }
 0x9bc   : > { %v2345_v30 = vsel %vm653_vm11, %v2338_v28, %v2340_v24  ;;  %2393 = vmatprep.subr.bf16.mxu0 %v2346_v29 }
 0x9bd   : > { %2394 = vmatpush1.bf16.msra.mxu0 %v2345_v30 }
 0x9be   : > { %v2344_v37 = vpop.permute.xlu1 %2343 }
 0x9bf   : > { %v2354_v20 = vpop.permute.xlu0 %2353  ;;  %v2347_v38 = vsel %vm653_vm11, %v2342_v27, %v2344_v37 }
 0x9c0   : > { %2437 = vmatpush1.bf16.msra.mxu1 %v2347_v38 }
 0x9c1   : > { %2438 = vmatprep.subr.bf16.mxu1 %v2840_v31 }
 0x9c2   : > { %v2356_v13 = vpop.permute.xlu1 %2355 }
 0x9c3   : > { %v2352_v16 = vpop.permute.xlu0 %2351  ;;  %v2360_v17 = vsel %vm3587_vm0, %v2354_v20, %v2356_v13 }
 0x9c4   : > { %v2359_v34 = vsel %vm3588_vm2, %v2352_v16, %v2354_v20  ;;  %2395 = vmatprep.subr.bf16.mxu0 %v2360_v17 }
 0x9c5   : > { %2396 = vmatpush1.bf16.msra.mxu0 %v2359_v34 }
 0x9c6   : > { %v2358_v44 = vpop.permute.xlu1 %2357 }
 0x9c7   : > { %v2361_v39 = vsel %vm3589_vm3, %v2356_v13, %v2358_v44 }
 0x9c8   : > { %2439 = vmatpush1.bf16.msra.mxu1 %v2361_v39  ;;  %2412 = vmatmul.mubr.bf16.vlgmr.msra.gmra.mrb[20].mxu0 %v2774_v35 }
 0x9cb   : > { %2455 = vmatmul.mubr.bf16.vlgmr.msra.gmra.mrb[20].mxu1 %v2774_v35 }
 0x9d4   : > { %v2465_v40 = vpop.permute.xlu0 %2464 }
 0x9d7   : > { %v2469_v31 = vpop.permute.xlu1 %2468 }
 0x9d9   : > { %v2483_v49 = vpop.permute.xlu0 %2482 }
 0x9dc   : > { %v2479_v42 = vpop.permute.xlu1 %2478 }
 0xa9b   : > { %v2413_v41 = vpop.f32.mrb[20].mxu0 }
 0xa9c   : > { %v2471_v43 = vmul.f32 %v2465_v40, %v2413_v41  ;;  %v2415_v46 = vpop.f32.mrb[21].mxu0 }
 0xa9d   : > { %v2472_v47 = vmul.f32 %v2465_v40, %v2415_v46  ;;  %v2417_v48 = vpop.f32.mrb[22].mxu0 }
 0xa9e   : > { %v2456_v50 = vpop.f32.mrb[20].mxu1  ;;  %v2474_v61 = vmul.f32 %v2469_v31, %v2417_v48  ;;  %v2419_v36 = vpop.f32.mrb[23].mxu0  ;;  %v2485_v45 = vadd.f32 %v2479_v42, %v2471_v43 }
 0xa9f   : > { %v2473_v3 = vmul.f32 %v2465_v40, %v2456_v50  ;;  %v2458_v51 = vpop.f32.mrb[21].mxu1  ;;  %v2475_v52 = vmul.f32 %v2469_v31, %v2419_v36  ;;  %v2486_v53 = vadd.f32 %v2479_v42, %v2472_v47 }
 0xaa0   : > { %v2459_v54 = vpop.f32.mrb[22].mxu1  ;;  %v2488_v55 = vadd.f32 %v2483_v49, %v2474_v61  ;;  %v2491_v56 = vmax.f32 %v2485_v45, 0.0 }
 0xaa1   : > { %v2476_v57 = vmul.f32 %v2469_v31, %v2459_v54  ;;  %v2461_v58 = vpop.f32.mrb[23].mxu1  ;;  %v2489_v60 = vadd.f32 %v2483_v49, %v2475_v52  ;;  %v2487_v59 = vadd.f32 %v2479_v42, %v2473_v3  ;;  %v2492_v4 = vmax.f32 %v2486_v53, 0.0 }
 0xaa2   : > { %v2494_v62 = vmax.f32 %v2488_v55, 0.0  ;;  %v2497_v63 = vmul.f32 %v2491_v56, %v3107_v10 }
 0xaa3   : > { %v2490_v0 = vadd.f32 %v2483_v49, %v2476_v57  ;;  %v2495_v1 = vmax.f32 %v2489_v60, 0.0  ;;  %v2493_v2 = vmax.f32 %v2487_v59, 0.0  ;;  %v2498_v5 = vmul.f32 %v2492_v4, %v3111_v15 }
 0xaa4   : > { %v2500_v26 = vmul.f32 %v2494_v62, %v3107_v10  ;;  %2503 = vst [vmem:[%s521_s19] sm:$0xff] %v2497_v63 }
 0xaa5   : > { %v2496_v32 = vmax.f32 %v2490_v0, 0.0  ;;  %v2501_v33 = vmul.f32 %v2495_v1, %v3111_v15  ;;  %v2499_v6 = vmul.f32 %v2493_v2, %v3115_v23  ;;  %2504 = vst [vmem:[%s521_s19 + $0x8] sm:$0xff] %v2498_v5 }
 0xaa6   : > { %2506 = vst [vmem:[%s521_s19 + $0x18] sm:$0xff] %v2500_v26 }
 0xaa7   : > { %v2502_v7 = vmul.f32 %v2496_v32, %v3115_v23  ;;  %2507 = vst [vmem:[%s521_s19 + $0x20] sm:$0xff] %v2501_v33  ;;  %2505 = vst [vmem:[%s521_s19 + $0x10] sm:$0xff] %v2499_v6 }
 0xaa9   : > { %2508 = vst [vmem:[%s521_s19 + $0x28] sm:$0xff] %v2502_v7 }
 0xaaa PF: > { %s26_s21 = sadd.s32 1, %s2827_s21  }
 0xaab   : > { %p23_p4 = scmp.ge.s32.totalorder %s26_s21, 4  }
 0xaad   :  { %25 = sbr.rel (!%p23_p4) target bundleno = 2 (0x2), region = 120 }

</bundles_post_ra>
